<compile_context>
chip_gen: v7x
topology: tpu7x:2x2x1
jax: 0.10.0
libtpu: 0.0.40
codegen_flags: <defaults>
</compile_context>

<pallas_src>
import functools

import jax
import jax.numpy as jnp
import numpy as np
from jax import lax
from jax.experimental import pallas as pl
from jax.experimental.pallas import tpu as pltpu

KER, STRI, PAD = 8, 4, 2      # DBlock defaults (k=8, s=4, p=2)
S = STRI                      # sub-pixel phase factor


# ---------------------------------------------------------------------------
# Pallas kernels: fused 3x3/s1 conv -> +bias -> PReLU -> [+/- residual]
# ---------------------------------------------------------------------------
def _conv3x3_accumulate(row_refs, w_ref, b_ref, a_ref):
    """row_refs: three (1,1,Wq+2,Cin) bf16 refs (vertical taps dh=0,1,2 of the
    coarsely padded input row band); w_ref: (3,3,Cin,Cout) bf16;
    b_ref: (1,Cout) f32; a_ref: (1,1) SMEM PReLU slope.  Returns (Wq,Cout) f32."""
    wq = row_refs[0].shape[2] - 2
    acc = None
    for dh in range(3):
        xrow = row_refs[dh][0, 0]                        # (Wq+2, Cin)
        for dw in range(3):
            win = xrow[dw:dw + wq, :]                    # static horizontal tap
            part = jnp.dot(win, w_ref[dh, dw],
                           preferred_element_type=jnp.float32)
            acc = part if acc is None else acc + part
    y = acc + b_ref[...]
    a = a_ref[0, 0]
    return jnp.where(y > 0, y, a * y)


def _conv3x3_kernel(r0, r1, r2, w_ref, b_ref, a_ref, o_ref):
    y = _conv3x3_accumulate((r0, r1, r2), w_ref, b_ref, a_ref)
    o_ref[0, 0] = y.astype(o_ref.dtype)


def _conv3x3_res_kernel(r0, r1, r2, w_ref, b_ref, a_ref, res_ref, o_ref, *, sign):
    y = _conv3x3_accumulate((r0, r1, r2), w_ref, b_ref, a_ref)
    r = res_ref[0, 0].astype(jnp.float32)
    y = y + r if sign >= 0 else y - r        # static sign: no runtime multiply
    o_ref[0, 0] = y.astype(o_ref.dtype)


def _phase_conv_layer(x, w3, bias, alpha, residual=None, sign=1,
                      out_dtype=jnp.bfloat16):
    """Fused 3x3/s1/p1 conv + bias + PReLU + optional (+/-) residual.
    x:(N,Hq,Wq,Cin) bf16, w3:(3,3,Cin,Cout) bf16, bias:(1,Cout) f32,
    alpha:(1,1) f32, residual:(N,Hq,Wq,Cout) bf16 or None."""
    N, Hq, Wq, Cin = x.shape
    Cout = w3.shape[-1]
    xp = jnp.pad(x, ((0, 0), (1, 1), (1, 1), (0, 0)))    # 1-px coarse halo

    def row_spec(dh):
        # One padded input row per step; vertical tap encoded in the index_map.
        return pl.BlockSpec((1, 1, Wq + 2, Cin),
                            lambda n, i, d=dh: (n, i + d, 0, 0))

    in_specs = [
        row_spec(0), row_spec(1), row_spec(2),
        pl.BlockSpec((3, 3, Cin, Cout), lambda n, i: (0, 0, 0, 0)),  # weights
        pl.BlockSpec((1, Cout), lambda n, i: (0, 0)),                # bias
        pl.BlockSpec((1, 1), lambda n, i: (0, 0),
                     memory_space=pltpu.MemorySpace.SMEM),           # PReLU a
    ]
    args = [xp, xp, xp, w3, bias, alpha]
    if residual is None:
        kernel = _conv3x3_kernel
        res_bytes = 0
    else:
        in_specs.append(pl.BlockSpec((1, 1, Wq, Cout),
                                     lambda n, i: (n, i, 0, 0)))
        args.append(residual)
        kernel = functools.partial(_conv3x3_res_kernel, sign=sign)
        res_bytes = residual.size * residual.dtype.itemsize

    out_bytes = N * Hq * Wq * Cout * jnp.dtype(out_dtype).itemsize
    cost = pl.CostEstimate(
        flops=2 * N * Hq * Wq * 9 * Cin * Cout,
        transcendentals=0,
        bytes_accessed=(3 * xp.size * 2 + w3.size * 2 + bias.size * 4
                        + res_bytes + out_bytes))

    return pl.pallas_call(
        kernel,
        out_shape=jax.ShapeDtypeStruct((N, Hq, Wq, Cout), out_dtype),
        grid_spec=pltpu.PrefetchScalarGridSpec(
            num_scalar_prefetch=0,
            grid=(N, Hq),
            in_specs=in_specs,
            out_specs=pl.BlockSpec((1, 1, Wq, Cout), lambda n, i: (n, i, 0, 0)),
        ),
        compiler_params=pltpu.CompilerParams(
            dimension_semantics=("parallel", "parallel"),
            # Per-step footprint is a few KiB..MiB -> 32 MiB is safe on every
            # generation (v7x physical VMEM is only 64 MiB).
            vmem_limit_bytes=32 * 1024 * 1024,
        ),
        cost_estimate=cost,
    )(*args)


# ---------------------------------------------------------------------------
# Phase-space weight packing & layout glue (plain JAX, one-time per call)
# ---------------------------------------------------------------------------
def _conv_phase_weight(w):
    """Conv2d(k=8,s=4,p=2) weight (Cout,Cin,8,8) -> (3,3,16*Cin,Cout) for the
    equivalent 3x3/s1 conv in phase space; input channels ordered (ph,pw,ci)."""
    Cout, Cin = w.shape[0], w.shape[1]
    d = np.arange(3)[:, None]
    r = np.arange(4)[None, :]
    k = 4 * d + r - 2                                    # (tap, phase) -> kh
    valid = (k >= 0) & (k < KER)
    kc = np.clip(k, 0, KER - 1)
    g = w[:, :, kc[:, :, None, None], kc[None, None, :, :]]  # (Co,Ci,dh,ph,dw,pw)
    mask = valid[:, :, None, None] & valid[None, None, :, :]
    g = g * jnp.asarray(mask, g.dtype)
    g = jnp.transpose(g, (2, 4, 3, 5, 1, 0))             # (dh,dw,ph,pw,Ci,Co)
    return g.reshape(3, 3, S * S * Cin, Cout)


def _deconv_phase_weight(wt):
    """ConvTranspose2d(k=8,s=4,p=2) weight (Cin,Cout,8,8) -> (3,3,Cin,16*Cout);
    output channels ordered (rh,rw,co) == the s2d phase order."""
    Cin, Cout = wt.shape[0], wt.shape[1]
    d = np.arange(3)[:, None]
    r = np.arange(4)[None, :]
    k = r + 6 - 4 * d                                    # (tap, phase) -> kh
    valid = (k >= 0) & (k < KER)
    kc = np.clip(k, 0, KER - 1)
    g = wt[:, :, kc[:, :, None, None], kc[None, None, :, :]]  # (Ci,Co,dh,rh,dw,rw)
    mask = valid[:, :, None, None] & valid[None, None, :, :]
    g = g * jnp.asarray(mask, g.dtype)
    g = jnp.transpose(g, (2, 4, 0, 3, 5, 1))             # (dh,dw,Ci,rh,rw,Co)
    return g.reshape(3, 3, Cin, S * S * Cout)


def _space_to_depth(x_nhwc):
    """(N, 4*Hq, 4*Wq, C) -> (N, Hq, Wq, 16*C), channels ordered (ph, pw, c)."""
    N, H, W, C = x_nhwc.shape
    Hq, Wq = H // S, W // S
    t = x_nhwc.reshape(N, Hq, S, Wq, S, C).transpose(0, 1, 3, 2, 4, 5)
    return t.reshape(N, Hq, Wq, S * S * C)


# ---------------------------------------------------------------------------
# DBlock forward
# ---------------------------------------------------------------------------
@jax.jit
def dblock_forward(x_nchw, params):
    f32, bf16 = jnp.float32, jnp.bfloat16
    N, C, H, W = x_nchw.shape
    assert H % S == 0 and W % S == 0, "DBlock requires H, W divisible by 4"
    Hq, Wq = H // S, W // S

    # Entry layout: NCHW -> NHWC -> phase space (s2d by 4), cast bf16 once.
    x_nhwc = jnp.transpose(x_nchw, (0, 2, 3, 1)).astype(f32)
    x_s2d = _space_to_depth(x_nhwc).astype(bf16)          # (N,Hq,Wq,16C)

    # Weight/bias packing (value-preserving gathers -> cast order irrelevant).
    w1 = _conv_phase_weight(params["w1"]).astype(bf16)    # (3,3,16C,C)
    wd = _deconv_phase_weight(params["wt"]).astype(bf16)  # (3,3,C,16C)
    w2 = _conv_phase_weight(params["w2"]).astype(bf16)    # (3,3,16C,C)
    b1 = params["b1"].reshape(1, C).astype(f32)
    bt = jnp.broadcast_to(params["bt"].astype(f32)[None, :],
                          (S * S, C)).reshape(1, S * S * C)
    b2 = params["b2"].reshape(1, C).astype(f32)
    a1 = params["a1"].reshape(1, 1).astype(f32)
    at = params["at"].reshape(1, 1).astype(f32)
    a2 = params["a2"].reshape(1, 1).astype(f32)

    # Layer 1: x1 = PReLU(Conv(x))                         (N,Hq,Wq,C)  bf16
    x1 = _phase_conv_layer(x_s2d, w1, b1, a1)

    # Layer 2: x2 = PReLU(Deconv(x1)) - x ; output IS s2d(x2): (N,Hq,Wq,16C)
    x2_s2d = _phase_conv_layer(x1, wd, bt, at, residual=x_s2d, sign=-1)

    # Layer 3: x3 = PReLU(Conv(x2)) + x1                   (N,Hq,Wq,C)  f32
    x3 = _phase_conv_layer(x2_s2d, w2, b2, a2, residual=x1, sign=+1,
                           out_dtype=f32)
    return jnp.transpose(x3, (0, 3, 1, 2))                 # NCHW at exit


# ---------------------------------------------------------------------------
# Pure-JAX references
# ---------------------------------------------------------------------------
def _prelu(y, a):
    return jnp.where(y > 0, y, a * y)


def _conv_ref(z, w, b, dt):
    y = lax.conv_general_dilated(
        z.astype(dt), w.astype(dt), (STRI, STRI), [(PAD, PAD)] * 2,
        dimension_numbers=("NCHW", "OIHW", "NCHW"),
        preferred_element_type=jnp.float32)
    return y + b[None, :, None, None]


def _deconv_ref(z, wt, b, dt):
    w = jnp.transpose(wt, (1, 0, 2, 3))[:, :, ::-1, ::-1]
    y = lax.conv_general_dilated(
        z.astype(dt), w.astype(dt), (1, 1), [(KER - 1 - PAD,) * 2] * 2,
        lhs_dilation=(STRI, STRI),
        dimension_numbers=("NCHW", "OIHW", "NCHW"),
        preferred_element_type=jnp.float32)
    return y + b[None, :, None, None]


def dblock_reference(x, params):
    """Full-precision (f32) reference DBlock."""
    a1 = params["a1"].reshape(())
    at = params["at"].reshape(())
    a2 = params["a2"].reshape(())
    x1 = _prelu(_conv_ref(x, params["w1"], params["b1"], jnp.float32), a1)
    x2 = _prelu(_deconv_ref(x1, params["wt"], params["bt"], jnp.float32), at) - x
    x3 = _prelu(_conv_ref(x2, params["w2"], params["b2"], jnp.float32), a2) + x1
    return x3


def dblock_reference_quantized(x, params):
    """Reference with the kernel's precision policy: bf16 MXU operands, f32
    accumulation / bias / PReLU / residual math, bf16 storage of the two
    inter-layer activations."""
    bf16, f32 = jnp.bfloat16, jnp.float32
    a1 = params["a1"].reshape(())
    at = params["at"].reshape(())
    a2 = params["a2"].reshape(())
    xq = x.astype(bf16)
    x1 = _prelu(_conv_ref(xq, params["w1"], params["b1"], bf16), a1).astype(bf16)
    x2 = (_prelu(_deconv_ref(x1, params["wt"], params["bt"], bf16), at)
          - xq.astype(f32)).astype(bf16)
    x3 = _prelu(_conv_ref(x2, params["w2"], params["b2"], bf16), a2) + x1.astype(f32)
    return x3


# ---------------------------------------------------------------------------
if __name__ == "__main__":
    N, C, H, W = 2, 4, 16, 16          # DBlock(fil=4) at a small test size
    key = jax.random.PRNGKey(0)
    kx, k1, k2, k3, k4, k5, k6 = jax.random.split(key, 7)

    x = jax.random.normal(kx, (N, C, H, W), jnp.float32)
    params = {
        # Conv2d weights: (Cout, Cin, k, k); ConvTranspose2d: (Cin, Cout, k, k)
        "w1": 0.05 * jax.random.normal(k1, (C, C, KER, KER), jnp.float32),
        "b1": 0.05 * jax.random.normal(k2, (C,), jnp.float32),
        "a1": jnp.full((1,), 0.25, jnp.float32),   # PReLU default init
        "wt": 0.05 * jax.random.normal(k3, (C, C, KER, KER), jnp.float32),
        "bt": 0.05 * jax.random.normal(k4, (C,), jnp.float32),
        "at": jnp.full((1,), 0.25, jnp.float32),
        "w2": 0.05 * jax.random.normal(k5, (C, C, KER, KER), jnp.float32),
        "b2": 0.05 * jax.random.normal(k6, (C,), jnp.float32),
        "a2": jnp.full((1,), 0.25, jnp.float32),
    }

    out = jax.block_until_ready(dblock_forward(x, params))

    # Conv(s=4) -> Deconv(s=4) -> Conv(s=4) yields (N, C, H//4, W//4).
    assert out.shape == (N, C, H // STRI, W // STRI), out.shape

    # Precision-matched check (same bf16 operand / bf16-storage policy):
    ref_q = jax.block_until_ready(dblock_reference_quantized(x, params))
    np.testing.assert_allclose(np.asarray(out), np.asarray(ref_q),
                               rtol=1e-2, atol=1e-2)

    # Semantic check vs the full-f32 reference; tolerance covers the
    # deliberate bf16 MXU operands and bf16 inter-layer activation storage.
    ref_f = jax.block_until_ready(dblock_reference(x, params))
    np.testing.assert_allclose(np.asarray(out), np.asarray(ref_f),
                               rtol=5e-2, atol=5e-2)

    print("KERNEL_OK")
</pallas_src>

<mosaic_0001>
module attributes {stable_mosaic.version = 11 : i64} {
  func.func @_conv3x3_kernel(%arg0: i32, %arg1: i32, %arg2: memref<1x1x6x64xbf16, #tpu.memory_space<vmem>>, %arg3: memref<1x1x6x64xbf16, #tpu.memory_space<vmem>>, %arg4: memref<1x1x6x64xbf16, #tpu.memory_space<vmem>>, %arg5: memref<3x3x64x4xbf16, #tpu.memory_space<vmem>>, %arg6: memref<1x4xf32, #tpu.memory_space<vmem>>, %arg7: memref<1x1xf32, #tpu.memory_space<smem>>, %arg8: memref<1x1x4x4xbf16, #tpu.memory_space<vmem>>) attributes {dimension_semantics = [#tpu.dimension_semantics<parallel>, #tpu.dimension_semantics<parallel>], iteration_bounds = array<i64: 2, 4>, scalar_prefetch = 0 : i64, scratch_operands = 0 : i64, tpu.core_type = #tpu.core_type<tc>, window_params = [{transform_indices = @transform_0, window_bounds = array<i64: 1, 1, 6, 64>}, {transform_indices = @transform_1, window_bounds = array<i64: 1, 1, 6, 64>}, {transform_indices = @transform_2, window_bounds = array<i64: 1, 1, 6, 64>}, {pipeline_mode = #tpu.pipeline_mode<synchronous>, transform_indices = @transform_3, window_bounds = array<i64: 3, 3, 64, 4>}, {pipeline_mode = #tpu.pipeline_mode<synchronous>, transform_indices = @transform_4, window_bounds = array<i64: 1, 4>}, {transform_indices = @transform_5, window_bounds = array<i64: 1, 1>}, {transform_indices = @transform_6, window_bounds = array<i64: 1, 1, 4, 4>}]} {
    %c0 = arith.constant 0 : index
    %c0_0 = arith.constant 0 : index
    %c0_1 = arith.constant 0 : index
    %c0_2 = arith.constant 0 : index
    %0 = vector.load %arg2[%c0, %c0_0, %c0_1, %c0_2] : memref<1x1x6x64xbf16, #tpu.memory_space<vmem>>, vector<1x1x6x64xbf16>
    %1 = vector.shape_cast %0 : vector<1x1x6x64xbf16> to vector<6x64xbf16>
    %2 = vector.extract_strided_slice %1 {offsets = [0, 0], sizes = [4, 64], strides = [1, 1]} : vector<6x64xbf16> to vector<4x64xbf16>
    %c0_3 = arith.constant 0 : index
    %c0_4 = arith.constant 0 : index
    %c0_5 = arith.constant 0 : index
    %c0_6 = arith.constant 0 : index
    %3 = vector.load %arg5[%c0_3, %c0_4, %c0_5, %c0_6] : memref<3x3x64x4xbf16, #tpu.memory_space<vmem>>, vector<1x1x64x4xbf16>
    %4 = vector.shape_cast %3 : vector<1x1x64x4xbf16> to vector<64x4xbf16>
    %cst = arith.constant dense<0.000000e+00> : vector<4x4xf32>
    %5 = tpu.matmul %2, %4, %cst {dimension_numbers = #tpu.dot_dimension_numbers<[1], [0], [0], [1], [0, 0, 1, 1], [], []>} : vector<4x64xbf16>, vector<64x4xbf16>, vector<4x4xf32> -> vector<4x4xf32>
    %6 = vector.extract_strided_slice %1 {offsets = [1, 0], sizes = [4, 64], strides = [1, 1]} : vector<6x64xbf16> to vector<4x64xbf16>
    %c0_7 = arith.constant 0 : index
    %c1 = arith.constant 1 : index
    %c0_8 = arith.constant 0 : index
    %c0_9 = arith.constant 0 : index
    %7 = vector.load %arg5[%c0_7, %c1, %c0_8, %c0_9] : memref<3x3x64x4xbf16, #tpu.memory_space<vmem>>, vector<1x1x64x4xbf16>
    %8 = vector.shape_cast %7 : vector<1x1x64x4xbf16> to vector<64x4xbf16>
    %cst_10 = arith.constant dense<0.000000e+00> : vector<4x4xf32>
    %9 = tpu.matmul %6, %8, %cst_10 {dimension_numbers = #tpu.dot_dimension_numbers<[1], [0], [0], [1], [0, 0, 1, 1], [], []>} : vector<4x64xbf16>, vector<64x4xbf16>, vector<4x4xf32> -> vector<4x4xf32>
    %10 = arith.addf %5, %9 : vector<4x4xf32>
    %11 = vector.extract_strided_slice %1 {offsets = [2, 0], sizes = [4, 64], strides = [1, 1]} : vector<6x64xbf16> to vector<4x64xbf16>
    %c0_11 = arith.constant 0 : index
    %c2 = arith.constant 2 : index
    %c0_12 = arith.constant 0 : index
    %c0_13 = arith.constant 0 : index
    %12 = vector.load %arg5[%c0_11, %c2, %c0_12, %c0_13] : memref<3x3x64x4xbf16, #tpu.memory_space<vmem>>, vector<1x1x64x4xbf16>
    %13 = vector.shape_cast %12 : vector<1x1x64x4xbf16> to vector<64x4xbf16>
    %cst_14 = arith.constant dense<0.000000e+00> : vector<4x4xf32>
    %14 = tpu.matmul %11, %13, %cst_14 {dimension_numbers = #tpu.dot_dimension_numbers<[1], [0], [0], [1], [0, 0, 1, 1], [], []>} : vector<4x64xbf16>, vector<64x4xbf16>, vector<4x4xf32> -> vector<4x4xf32>
    %15 = arith.addf %10, %14 : vector<4x4xf32>
    %c0_15 = arith.constant 0 : index
    %c0_16 = arith.constant 0 : index
    %c0_17 = arith.constant 0 : index
    %c0_18 = arith.constant 0 : index
    %16 = vector.load %arg3[%c0_15, %c0_16, %c0_17, %c0_18] : memref<1x1x6x64xbf16, #tpu.memory_space<vmem>>, vector<1x1x6x64xbf16>
    %17 = vector.shape_cast %16 : vector<1x1x6x64xbf16> to vector<6x64xbf16>
    %18 = vector.extract_strided_slice %17 {offsets = [0, 0], sizes = [4, 64], strides = [1, 1]} : vector<6x64xbf16> to vector<4x64xbf16>
    %c1_19 = arith.constant 1 : index
    %c0_20 = arith.constant 0 : index
    %c0_21 = arith.constant 0 : index
    %c0_22 = arith.constant 0 : index
    %19 = vector.load %arg5[%c1_19, %c0_20, %c0_21, %c0_22] : memref<3x3x64x4xbf16, #tpu.memory_space<vmem>>, vector<1x1x64x4xbf16>
    %20 = vector.shape_cast %19 : vector<1x1x64x4xbf16> to vector<64x4xbf16>
    %cst_23 = arith.constant dense<0.000000e+00> : vector<4x4xf32>
    %21 = tpu.matmul %18, %20, %cst_23 {dimension_numbers = #tpu.dot_dimension_numbers<[1], [0], [0], [1], [0, 0, 1, 1], [], []>} : vector<4x64xbf16>, vector<64x4xbf16>, vector<4x4xf32> -> vector<4x4xf32>
    %22 = arith.addf %15, %21 : vector<4x4xf32>
    %23 = vector.extract_strided_slice %17 {offsets = [1, 0], sizes = [4, 64], strides = [1, 1]} : vector<6x64xbf16> to vector<4x64xbf16>
    %c1_24 = arith.constant 1 : index
    %c1_25 = arith.constant 1 : index
    %c0_26 = arith.constant 0 : index
    %c0_27 = arith.constant 0 : index
    %24 = vector.load %arg5[%c1_24, %c1_25, %c0_26, %c0_27] : memref<3x3x64x4xbf16, #tpu.memory_space<vmem>>, vector<1x1x64x4xbf16>
    %25 = vector.shape_cast %24 : vector<1x1x64x4xbf16> to vector<64x4xbf16>
    %cst_28 = arith.constant dense<0.000000e+00> : vector<4x4xf32>
    %26 = tpu.matmul %23, %25, %cst_28 {dimension_numbers = #tpu.dot_dimension_numbers<[1], [0], [0], [1], [0, 0, 1, 1], [], []>} : vector<4x64xbf16>, vector<64x4xbf16>, vector<4x4xf32> -> vector<4x4xf32>
    %27 = arith.addf %22, %26 : vector<4x4xf32>
    %28 = vector.extract_strided_slice %17 {offsets = [2, 0], sizes = [4, 64], strides = [1, 1]} : vector<6x64xbf16> to vector<4x64xbf16>
    %c1_29 = arith.constant 1 : index
    %c2_30 = arith.constant 2 : index
    %c0_31 = arith.constant 0 : index
    %c0_32 = arith.constant 0 : index
    %29 = vector.load %arg5[%c1_29, %c2_30, %c0_31, %c0_32] : memref<3x3x64x4xbf16, #tpu.memory_space<vmem>>, vector<1x1x64x4xbf16>
    %30 = vector.shape_cast %29 : vector<1x1x64x4xbf16> to vector<64x4xbf16>
    %cst_33 = arith.constant dense<0.000000e+00> : vector<4x4xf32>
    %31 = tpu.matmul %28, %30, %cst_33 {dimension_numbers = #tpu.dot_dimension_numbers<[1], [0], [0], [1], [0, 0, 1, 1], [], []>} : vector<4x64xbf16>, vector<64x4xbf16>, vector<4x4xf32> -> vector<4x4xf32>
    %32 = arith.addf %27, %31 : vector<4x4xf32>
    %c0_34 = arith.constant 0 : index
    %c0_35 = arith.constant 0 : index
    %c0_36 = arith.constant 0 : index
    %c0_37 = arith.constant 0 : index
    %33 = vector.load %arg4[%c0_34, %c0_35, %c0_36, %c0_37] : memref<1x1x6x64xbf16, #tpu.memory_space<vmem>>, vector<1x1x6x64xbf16>
    %34 = vector.shape_cast %33 : vector<1x1x6x64xbf16> to vector<6x64xbf16>
    %35 = vector.extract_strided_slice %34 {offsets = [0, 0], sizes = [4, 64], strides = [1, 1]} : vector<6x64xbf16> to vector<4x64xbf16>
    %c2_38 = arith.constant 2 : index
    %c0_39 = arith.constant 0 : index
    %c0_40 = arith.constant 0 : index
    %c0_41 = arith.constant 0 : index
    %36 = vector.load %arg5[%c2_38, %c0_39, %c0_40, %c0_41] : memref<3x3x64x4xbf16, #tpu.memory_space<vmem>>, vector<1x1x64x4xbf16>
    %37 = vector.shape_cast %36 : vector<1x1x64x4xbf16> to vector<64x4xbf16>
    %cst_42 = arith.constant dense<0.000000e+00> : vector<4x4xf32>
    %38 = tpu.matmul %35, %37, %cst_42 {dimension_numbers = #tpu.dot_dimension_numbers<[1], [0], [0], [1], [0, 0, 1, 1], [], []>} : vector<4x64xbf16>, vector<64x4xbf16>, vector<4x4xf32> -> vector<4x4xf32>
    %39 = arith.addf %32, %38 : vector<4x4xf32>
    %40 = vector.extract_strided_slice %34 {offsets = [1, 0], sizes = [4, 64], strides = [1, 1]} : vector<6x64xbf16> to vector<4x64xbf16>
    %c2_43 = arith.constant 2 : index
    %c1_44 = arith.constant 1 : index
    %c0_45 = arith.constant 0 : index
    %c0_46 = arith.constant 0 : index
    %41 = vector.load %arg5[%c2_43, %c1_44, %c0_45, %c0_46] : memref<3x3x64x4xbf16, #tpu.memory_space<vmem>>, vector<1x1x64x4xbf16>
    %42 = vector.shape_cast %41 : vector<1x1x64x4xbf16> to vector<64x4xbf16>
    %cst_47 = arith.constant dense<0.000000e+00> : vector<4x4xf32>
    %43 = tpu.matmul %40, %42, %cst_47 {dimension_numbers = #tpu.dot_dimension_numbers<[1], [0], [0], [1], [0, 0, 1, 1], [], []>} : vector<4x64xbf16>, vector<64x4xbf16>, vector<4x4xf32> -> vector<4x4xf32>
    %44 = arith.addf %39, %43 : vector<4x4xf32>
    %45 = vector.extract_strided_slice %34 {offsets = [2, 0], sizes = [4, 64], strides = [1, 1]} : vector<6x64xbf16> to vector<4x64xbf16>
    %c2_48 = arith.constant 2 : index
    %c2_49 = arith.constant 2 : index
    %c0_50 = arith.constant 0 : index
    %c0_51 = arith.constant 0 : index
    %46 = vector.load %arg5[%c2_48, %c2_49, %c0_50, %c0_51] : memref<3x3x64x4xbf16, #tpu.memory_space<vmem>>, vector<1x1x64x4xbf16>
    %47 = vector.shape_cast %46 : vector<1x1x64x4xbf16> to vector<64x4xbf16>
    %cst_52 = arith.constant dense<0.000000e+00> : vector<4x4xf32>
    %48 = tpu.matmul %45, %47, %cst_52 {dimension_numbers = #tpu.dot_dimension_numbers<[1], [0], [0], [1], [0, 0, 1, 1], [], []>} : vector<4x64xbf16>, vector<64x4xbf16>, vector<4x4xf32> -> vector<4x4xf32>
    %49 = arith.addf %44, %48 : vector<4x4xf32>
    %c0_53 = arith.constant 0 : index
    %c0_54 = arith.constant 0 : index
    %50 = vector.load %arg6[%c0_53, %c0_54] : memref<1x4xf32, #tpu.memory_space<vmem>>, vector<1x4xf32>
    %51 = vector.broadcast %50 : vector<1x4xf32> to vector<4x4xf32>
    %52 = arith.addf %49, %51 : vector<4x4xf32>
    %c0_55 = arith.constant 0 : index
    %c0_56 = arith.constant 0 : index
    %53 = memref.load %arg7[%c0_55, %c0_56] : memref<1x1xf32, #tpu.memory_space<smem>>
    %cst_57 = arith.constant 0.000000e+00 : f32
    %54 = vector.broadcast %cst_57 : f32 to vector<4x4xf32>
    %55 = arith.cmpf ogt, %52, %54 : vector<4x4xf32>
    %56 = vector.broadcast %53 : f32 to vector<4x4xf32>
    %57 = arith.mulf %56, %52 : vector<4x4xf32>
    %58 = arith.select %55, %52, %57 : vector<4x4xi1>, vector<4x4xf32>
    %59 = arith.truncf %58 : vector<4x4xf32> to vector<4x4xbf16>
    %c0_58 = arith.constant 0 : index
    %c0_59 = arith.constant 0 : index
    %c0_60 = arith.constant 0 : index
    %c0_61 = arith.constant 0 : index
    %60 = vector.load %arg8[%c0_58, %c0_59, %c0_60, %c0_61] : memref<1x1x4x4xbf16, #tpu.memory_space<vmem>>, vector<1x1x4x4xbf16>
    %61 = vector.shape_cast %60 : vector<1x1x4x4xbf16> to vector<4x4xbf16>
    %62 = vector.shape_cast %59 : vector<4x4xbf16> to vector<1x1x4x4xbf16>
    tpu.vector_store %arg8[%c0_58, %c0_59, %c0_60, %c0_61], %62 {strides = array<i32>} : memref<1x1x4x4xbf16, #tpu.memory_space<vmem>>, vector<1x1x4x4xbf16>,
    return
  }
  func.func @transform_0(%arg0: i32, %arg1: i32) -> (i32, i32, i32, i32) {
    %c0_i32 = arith.constant 0 : i32
    %0 = arith.addi %arg1, %c0_i32 : i32
    %c0_i32_0 = arith.constant 0 : i32
    %c0_i32_1 = arith.constant 0 : i32
    %c0_i32_2 = arith.constant 0 : i32
    return %arg0, %0, %c0_i32_0, %c0_i32_1 : i32, i32, i32, i32
  }
  func.func @transform_1(%arg0: i32, %arg1: i32) -> (i32, i32, i32, i32) {
    %c1_i32 = arith.constant 1 : i32
    %0 = arith.addi %arg1, %c1_i32 : i32
    %c0_i32 = arith.constant 0 : i32
    %c0_i32_0 = arith.constant 0 : i32
    %c0_i32_1 = arith.constant 0 : i32
    return %arg0, %0, %c0_i32, %c0_i32_0 : i32, i32, i32, i32
  }
  func.func @transform_2(%arg0: i32, %arg1: i32) -> (i32, i32, i32, i32) {
    %c2_i32 = arith.constant 2 : i32
    %0 = arith.addi %arg1, %c2_i32 : i32
    %c0_i32 = arith.constant 0 : i32
    %c0_i32_0 = arith.constant 0 : i32
    %c0_i32_1 = arith.constant 0 : i32
    return %arg0, %0, %c0_i32, %c0_i32_0 : i32, i32, i32, i32
  }
  func.func @transform_3(%arg0: i32, %arg1: i32) -> (i32, i32, i32, i32) {
    %c0_i32 = arith.constant 0 : i32
    %c0_i32_0 = arith.constant 0 : i32
    %c0_i32_1 = arith.constant 0 : i32
    %c0_i32_2 = arith.constant 0 : i32
    %c0_i32_3 = arith.constant 0 : i32
    return %c0_i32, %c0_i32_0, %c0_i32_1, %c0_i32_2 : i32, i32, i32, i32
  }
  func.func @transform_4(%arg0: i32, %arg1: i32) -> (i32, i32) {
    %c0_i32 = arith.constant 0 : i32
    %c0_i32_0 = arith.constant 0 : i32
    %c0_i32_1 = arith.constant 0 : i32
    return %c0_i32, %c0_i32_0 : i32, i32
  }
  func.func @transform_5(%arg0: i32, %arg1: i32) -> (i32, i32) {
    %c0_i32 = arith.constant 0 : i32
    %c0_i32_0 = arith.constant 0 : i32
    %c0_i32_1 = arith.constant 0 : i32
    return %c0_i32, %c0_i32_0 : i32, i32
  }
  func.func @transform_6(%arg0: i32, %arg1: i32) -> (i32, i32, i32, i32) {
    %c0_i32 = arith.constant 0 : i32
    %c0_i32_0 = arith.constant 0 : i32
    %c0_i32_1 = arith.constant 0 : i32
    return %arg0, %arg1, %c0_i32, %c0_i32_0 : i32, i32, i32, i32
  }
}

module attributes {stable_mosaic.version = 11 : i64} {
  func.func @_conv3x3_res_kernel(%arg0: i32, %arg1: i32, %arg2: memref<1x1x6x4xbf16, #tpu.memory_space<vmem>>, %arg3: memref<1x1x6x4xbf16, #tpu.memory_space<vmem>>, %arg4: memref<1x1x6x4xbf16, #tpu.memory_space<vmem>>, %arg5: memref<3x3x4x64xbf16, #tpu.memory_space<vmem>>, %arg6: memref<1x64xf32, #tpu.memory_space<vmem>>, %arg7: memref<1x1xf32, #tpu.memory_space<smem>>, %arg8: memref<1x1x4x64xbf16, #tpu.memory_space<vmem>>, %arg9: memref<1x1x4x64xbf16, #tpu.memory_space<vmem>>) attributes {dimension_semantics = [#tpu.dimension_semantics<parallel>, #tpu.dimension_semantics<parallel>], iteration_bounds = array<i64: 2, 4>, scalar_prefetch = 0 : i64, scratch_operands = 0 : i64, tpu.core_type = #tpu.core_type<tc>, window_params = [{transform_indices = @transform_0, window_bounds = array<i64: 1, 1, 6, 4>}, {transform_indices = @transform_1, window_bounds = array<i64: 1, 1, 6, 4>}, {transform_indices = @transform_2, window_bounds = array<i64: 1, 1, 6, 4>}, {pipeline_mode = #tpu.pipeline_mode<synchronous>, transform_indices = @transform_3, window_bounds = array<i64: 3, 3, 4, 64>}, {pipeline_mode = #tpu.pipeline_mode<synchronous>, transform_indices = @transform_4, window_bounds = array<i64: 1, 64>}, {transform_indices = @transform_5, window_bounds = array<i64: 1, 1>}, {transform_indices = @transform_6, window_bounds = array<i64: 1, 1, 4, 64>}, {transform_indices = @transform_7, window_bounds = array<i64: 1, 1, 4, 64>}]} {
    %c0 = arith.constant 0 : index
    %c0_0 = arith.constant 0 : index
    %c0_1 = arith.constant 0 : index
    %c0_2 = arith.constant 0 : index
    %0 = vector.load %arg2[%c0, %c0_0, %c0_1, %c0_2] : memref<1x1x6x4xbf16, #tpu.memory_space<vmem>>, vector<1x1x6x4xbf16>
    %1 = vector.shape_cast %0 : vector<1x1x6x4xbf16> to vector<6x4xbf16>
    %2 = vector.extract_strided_slice %1 {offsets = [0, 0], sizes = [4, 4], strides = [1, 1]} : vector<6x4xbf16> to vector<4x4xbf16>
    %c0_3 = arith.constant 0 : index
    %c0_4 = arith.constant 0 : index
    %c0_5 = arith.constant 0 : index
    %c0_6 = arith.constant 0 : index
    %3 = vector.load %arg5[%c0_3, %c0_4, %c0_5, %c0_6] : memref<3x3x4x64xbf16, #tpu.memory_space<vmem>>, vector<1x1x4x64xbf16>
    %4 = vector.shape_cast %3 : vector<1x1x4x64xbf16> to vector<4x64xbf16>
    %cst = arith.constant dense<0.000000e+00> : vector<4x64xf32>
    %5 = tpu.matmul %2, %4, %cst {dimension_numbers = #tpu.dot_dimension_numbers<[1], [0], [0], [1], [0, 0, 1, 1], [], []>} : vector<4x4xbf16>, vector<4x64xbf16>, vector<4x64xf32> -> vector<4x64xf32>
    %6 = vector.extract_strided_slice %1 {offsets = [1, 0], sizes = [4, 4], strides = [1, 1]} : vector<6x4xbf16> to vector<4x4xbf16>
    %c0_7 = arith.constant 0 : index
    %c1 = arith.constant 1 : index
    %c0_8 = arith.constant 0 : index
    %c0_9 = arith.constant 0 : index
    %7 = vector.load %arg5[%c0_7, %c1, %c0_8, %c0_9] : memref<3x3x4x64xbf16, #tpu.memory_space<vmem>>, vector<1x1x4x64xbf16>
    %8 = vector.shape_cast %7 : vector<1x1x4x64xbf16> to vector<4x64xbf16>
    %cst_10 = arith.constant dense<0.000000e+00> : vector<4x64xf32>
    %9 = tpu.matmul %6, %8, %cst_10 {dimension_numbers = #tpu.dot_dimension_numbers<[1], [0], [0], [1], [0, 0, 1, 1], [], []>} : vector<4x4xbf16>, vector<4x64xbf16>, vector<4x64xf32> -> vector<4x64xf32>
    %10 = arith.addf %5, %9 : vector<4x64xf32>
    %11 = vector.extract_strided_slice %1 {offsets = [2, 0], sizes = [4, 4], strides = [1, 1]} : vector<6x4xbf16> to vector<4x4xbf16>
    %c0_11 = arith.constant 0 : index
    %c2 = arith.constant 2 : index
    %c0_12 = arith.constant 0 : index
    %c0_13 = arith.constant 0 : index
    %12 = vector.load %arg5[%c0_11, %c2, %c0_12, %c0_13] : memref<3x3x4x64xbf16, #tpu.memory_space<vmem>>, vector<1x1x4x64xbf16>
    %13 = vector.shape_cast %12 : vector<1x1x4x64xbf16> to vector<4x64xbf16>
    %cst_14 = arith.constant dense<0.000000e+00> : vector<4x64xf32>
    %14 = tpu.matmul %11, %13, %cst_14 {dimension_numbers = #tpu.dot_dimension_numbers<[1], [0], [0], [1], [0, 0, 1, 1], [], []>} : vector<4x4xbf16>, vector<4x64xbf16>, vector<4x64xf32> -> vector<4x64xf32>
    %15 = arith.addf %10, %14 : vector<4x64xf32>
    %c0_15 = arith.constant 0 : index
    %c0_16 = arith.constant 0 : index
    %c0_17 = arith.constant 0 : index
    %c0_18 = arith.constant 0 : index
    %16 = vector.load %arg3[%c0_15, %c0_16, %c0_17, %c0_18] : memref<1x1x6x4xbf16, #tpu.memory_space<vmem>>, vector<1x1x6x4xbf16>
    %17 = vector.shape_cast %16 : vector<1x1x6x4xbf16> to vector<6x4xbf16>
    %18 = vector.extract_strided_slice %17 {offsets = [0, 0], sizes = [4, 4], strides = [1, 1]} : vector<6x4xbf16> to vector<4x4xbf16>
    %c1_19 = arith.constant 1 : index
    %c0_20 = arith.constant 0 : index
    %c0_21 = arith.constant 0 : index
    %c0_22 = arith.constant 0 : index
    %19 = vector.load %arg5[%c1_19, %c0_20, %c0_21, %c0_22] : memref<3x3x4x64xbf16, #tpu.memory_space<vmem>>, vector<1x1x4x64xbf16>
    %20 = vector.shape_cast %19 : vector<1x1x4x64xbf16> to vector<4x64xbf16>
    %cst_23 = arith.constant dense<0.000000e+00> : vector<4x64xf32>
    %21 = tpu.matmul %18, %20, %cst_23 {dimension_numbers = #tpu.dot_dimension_numbers<[1], [0], [0], [1], [0, 0, 1, 1], [], []>} : vector<4x4xbf16>, vector<4x64xbf16>, vector<4x64xf32> -> vector<4x64xf32>
    %22 = arith.addf %15, %21 : vector<4x64xf32>
    %23 = vector.extract_strided_slice %17 {offsets = [1, 0], sizes = [4, 4], strides = [1, 1]} : vector<6x4xbf16> to vector<4x4xbf16>
    %c1_24 = arith.constant 1 : index
    %c1_25 = arith.constant 1 : index
    %c0_26 = arith.constant 0 : index
    %c0_27 = arith.constant 0 : index
    %24 = vector.load %arg5[%c1_24, %c1_25, %c0_26, %c0_27] : memref<3x3x4x64xbf16, #tpu.memory_space<vmem>>, vector<1x1x4x64xbf16>
    %25 = vector.shape_cast %24 : vector<1x1x4x64xbf16> to vector<4x64xbf16>
    %cst_28 = arith.constant dense<0.000000e+00> : vector<4x64xf32>
    %26 = tpu.matmul %23, %25, %cst_28 {dimension_numbers = #tpu.dot_dimension_numbers<[1], [0], [0], [1], [0, 0, 1, 1], [], []>} : vector<4x4xbf16>, vector<4x64xbf16>, vector<4x64xf32> -> vector<4x64xf32>
    %27 = arith.addf %22, %26 : vector<4x64xf32>
    %28 = vector.extract_strided_slice %17 {offsets = [2, 0], sizes = [4, 4], strides = [1, 1]} : vector<6x4xbf16> to vector<4x4xbf16>
    %c1_29 = arith.constant 1 : index
    %c2_30 = arith.constant 2 : index
    %c0_31 = arith.constant 0 : index
    %c0_32 = arith.constant 0 : index
    %29 = vector.load %arg5[%c1_29, %c2_30, %c0_31, %c0_32] : memref<3x3x4x64xbf16, #tpu.memory_space<vmem>>, vector<1x1x4x64xbf16>
    %30 = vector.shape_cast %29 : vector<1x1x4x64xbf16> to vector<4x64xbf16>
    %cst_33 = arith.constant dense<0.000000e+00> : vector<4x64xf32>
    %31 = tpu.matmul %28, %30, %cst_33 {dimension_numbers = #tpu.dot_dimension_numbers<[1], [0], [0], [1], [0, 0, 1, 1], [], []>} : vector<4x4xbf16>, vector<4x64xbf16>, vector<4x64xf32> -> vector<4x64xf32>
    %32 = arith.addf %27, %31 : vector<4x64xf32>
    %c0_34 = arith.constant 0 : index
    %c0_35 = arith.constant 0 : index
    %c0_36 = arith.constant 0 : index
    %c0_37 = arith.constant 0 : index
    %33 = vector.load %arg4[%c0_34, %c0_35, %c0_36, %c0_37] : memref<1x1x6x4xbf16, #tpu.memory_space<vmem>>, vector<1x1x6x4xbf16>
    %34 = vector.shape_cast %33 : vector<1x1x6x4xbf16> to vector<6x4xbf16>
    %35 = vector.extract_strided_slice %34 {offsets = [0, 0], sizes = [4, 4], strides = [1, 1]} : vector<6x4xbf16> to vector<4x4xbf16>
    %c2_38 = arith.constant 2 : index
    %c0_39 = arith.constant 0 : index
    %c0_40 = arith.constant 0 : index
    %c0_41 = arith.constant 0 : index
    %36 = vector.load %arg5[%c2_38, %c0_39, %c0_40, %c0_41] : memref<3x3x4x64xbf16, #tpu.memory_space<vmem>>, vector<1x1x4x64xbf16>
    %37 = vector.shape_cast %36 : vector<1x1x4x64xbf16> to vector<4x64xbf16>
    %cst_42 = arith.constant dense<0.000000e+00> : vector<4x64xf32>
    %38 = tpu.matmul %35, %37, %cst_42 {dimension_numbers = #tpu.dot_dimension_numbers<[1], [0], [0], [1], [0, 0, 1, 1], [], []>} : vector<4x4xbf16>, vector<4x64xbf16>, vector<4x64xf32> -> vector<4x64xf32>
    %39 = arith.addf %32, %38 : vector<4x64xf32>
    %40 = vector.extract_strided_slice %34 {offsets = [1, 0], sizes = [4, 4], strides = [1, 1]} : vector<6x4xbf16> to vector<4x4xbf16>
    %c2_43 = arith.constant 2 : index
    %c1_44 = arith.constant 1 : index
    %c0_45 = arith.constant 0 : index
    %c0_46 = arith.constant 0 : index
    %41 = vector.load %arg5[%c2_43, %c1_44, %c0_45, %c0_46] : memref<3x3x4x64xbf16, #tpu.memory_space<vmem>>, vector<1x1x4x64xbf16>
    %42 = vector.shape_cast %41 : vector<1x1x4x64xbf16> to vector<4x64xbf16>
    %cst_47 = arith.constant dense<0.000000e+00> : vector<4x64xf32>
    %43 = tpu.matmul %40, %42, %cst_47 {dimension_numbers = #tpu.dot_dimension_numbers<[1], [0], [0], [1], [0, 0, 1, 1], [], []>} : vector<4x4xbf16>, vector<4x64xbf16>, vector<4x64xf32> -> vector<4x64xf32>
    %44 = arith.addf %39, %43 : vector<4x64xf32>
    %45 = vector.extract_strided_slice %34 {offsets = [2, 0], sizes = [4, 4], strides = [1, 1]} : vector<6x4xbf16> to vector<4x4xbf16>
    %c2_48 = arith.constant 2 : index
    %c2_49 = arith.constant 2 : index
    %c0_50 = arith.constant 0 : index
    %c0_51 = arith.constant 0 : index
    %46 = vector.load %arg5[%c2_48, %c2_49, %c0_50, %c0_51] : memref<3x3x4x64xbf16, #tpu.memory_space<vmem>>, vector<1x1x4x64xbf16>
    %47 = vector.shape_cast %46 : vector<1x1x4x64xbf16> to vector<4x64xbf16>
    %cst_52 = arith.constant dense<0.000000e+00> : vector<4x64xf32>
    %48 = tpu.matmul %45, %47, %cst_52 {dimension_numbers = #tpu.dot_dimension_numbers<[1], [0], [0], [1], [0, 0, 1, 1], [], []>} : vector<4x4xbf16>, vector<4x64xbf16>, vector<4x64xf32> -> vector<4x64xf32>
    %49 = arith.addf %44, %48 : vector<4x64xf32>
    %c0_53 = arith.constant 0 : index
    %c0_54 = arith.constant 0 : index
    %50 = vector.load %arg6[%c0_53, %c0_54] : memref<1x64xf32, #tpu.memory_space<vmem>>, vector<1x64xf32>
    %51 = vector.broadcast %50 : vector<1x64xf32> to vector<4x64xf32>
    %52 = arith.addf %49, %51 : vector<4x64xf32>
    %c0_55 = arith.constant 0 : index
    %c0_56 = arith.constant 0 : index
    %53 = memref.load %arg7[%c0_55, %c0_56] : memref<1x1xf32, #tpu.memory_space<smem>>
    %cst_57 = arith.constant 0.000000e+00 : f32
    %54 = vector.broadcast %cst_57 : f32 to vector<4x64xf32>
    %55 = arith.cmpf ogt, %52, %54 : vector<4x64xf32>
    %56 = vector.broadcast %53 : f32 to vector<4x64xf32>
    %57 = arith.mulf %56, %52 : vector<4x64xf32>
    %58 = arith.select %55, %52, %57 : vector<4x64xi1>, vector<4x64xf32>
    %c0_58 = arith.constant 0 : index
    %c0_59 = arith.constant 0 : index
    %c0_60 = arith.constant 0 : index
    %c0_61 = arith.constant 0 : index
    %59 = vector.load %arg8[%c0_58, %c0_59, %c0_60, %c0_61] : memref<1x1x4x64xbf16, #tpu.memory_space<vmem>>, vector<1x1x4x64xbf16>
    %60 = vector.shape_cast %59 : vector<1x1x4x64xbf16> to vector<4x64xbf16>
    %61 = arith.extf %60 : vector<4x64xbf16> to vector<4x64xf32>
    %62 = arith.subf %58, %61 : vector<4x64xf32>
    %63 = arith.truncf %62 : vector<4x64xf32> to vector<4x64xbf16>
    %c0_62 = arith.constant 0 : index
    %c0_63 = arith.constant 0 : index
    %c0_64 = arith.constant 0 : index
    %c0_65 = arith.constant 0 : index
    %64 = vector.load %arg9[%c0_62, %c0_63, %c0_64, %c0_65] : memref<1x1x4x64xbf16, #tpu.memory_space<vmem>>, vector<1x1x4x64xbf16>
    %65 = vector.shape_cast %64 : vector<1x1x4x64xbf16> to vector<4x64xbf16>
    %66 = vector.shape_cast %63 : vector<4x64xbf16> to vector<1x1x4x64xbf16>
    tpu.vector_store %arg9[%c0_62, %c0_63, %c0_64, %c0_65], %66 {strides = array<i32>} : memref<1x1x4x64xbf16, #tpu.memory_space<vmem>>, vector<1x1x4x64xbf16>,
    return
  }
  func.func @transform_0(%arg0: i32, %arg1: i32) -> (i32, i32, i32, i32) {
    %c0_i32 = arith.constant 0 : i32
    %0 = arith.addi %arg1, %c0_i32 : i32
    %c0_i32_0 = arith.constant 0 : i32
    %c0_i32_1 = arith.constant 0 : i32
    %c0_i32_2 = arith.constant 0 : i32
    return %arg0, %0, %c0_i32_0, %c0_i32_1 : i32, i32, i32, i32
  }
  func.func @transform_1(%arg0: i32, %arg1: i32) -> (i32, i32, i32, i32) {
    %c1_i32 = arith.constant 1 : i32
    %0 = arith.addi %arg1, %c1_i32 : i32
    %c0_i32 = arith.constant 0 : i32
    %c0_i32_0 = arith.constant 0 : i32
    %c0_i32_1 = arith.constant 0 : i32
    return %arg0, %0, %c0_i32, %c0_i32_0 : i32, i32, i32, i32
  }
  func.func @transform_2(%arg0: i32, %arg1: i32) -> (i32, i32, i32, i32) {
    %c2_i32 = arith.constant 2 : i32
    %0 = arith.addi %arg1, %c2_i32 : i32
    %c0_i32 = arith.constant 0 : i32
    %c0_i32_0 = arith.constant 0 : i32
    %c0_i32_1 = arith.constant 0 : i32
    return %arg0, %0, %c0_i32, %c0_i32_0 : i32, i32, i32, i32
  }
  func.func @transform_3(%arg0: i32, %arg1: i32) -> (i32, i32, i32, i32) {
    %c0_i32 = arith.constant 0 : i32
    %c0_i32_0 = arith.constant 0 : i32
    %c0_i32_1 = arith.constant 0 : i32
    %c0_i32_2 = arith.constant 0 : i32
    %c0_i32_3 = arith.constant 0 : i32
    return %c0_i32, %c0_i32_0, %c0_i32_1, %c0_i32_2 : i32, i32, i32, i32
  }
  func.func @transform_4(%arg0: i32, %arg1: i32) -> (i32, i32) {
    %c0_i32 = arith.constant 0 : i32
    %c0_i32_0 = arith.constant 0 : i32
    %c0_i32_1 = arith.constant 0 : i32
    return %c0_i32, %c0_i32_0 : i32, i32
  }
  func.func @transform_5(%arg0: i32, %arg1: i32) -> (i32, i32) {
    %c0_i32 = arith.constant 0 : i32
    %c0_i32_0 = arith.constant 0 : i32
    %c0_i32_1 = arith.constant 0 : i32
    return %c0_i32, %c0_i32_0 : i32, i32
  }
  func.func @transform_6(%arg0: i32, %arg1: i32) -> (i32, i32, i32, i32) {
    %c0_i32 = arith.constant 0 : i32
    %c0_i32_0 = arith.constant 0 : i32
    %c0_i32_1 = arith.constant 0 : i32
    return %arg0, %arg1, %c0_i32, %c0_i32_0 : i32, i32, i32, i32
  }
  func.func @transform_7(%arg0: i32, %arg1: i32) -> (i32, i32, i32, i32) {
    %c0_i32 = arith.constant 0 : i32
    %c0_i32_0 = arith.constant 0 : i32
    %c0_i32_1 = arith.constant 0 : i32
    return %arg0, %arg1, %c0_i32, %c0_i32_0 : i32, i32, i32, i32
  }
}

module attributes {stable_mosaic.version = 11 : i64} {
  func.func @_conv3x3_res_kernel(%arg0: i32, %arg1: i32, %arg2: memref<1x1x6x64xbf16, #tpu.memory_space<vmem>>, %arg3: memref<1x1x6x64xbf16, #tpu.memory_space<vmem>>, %arg4: memref<1x1x6x64xbf16, #tpu.memory_space<vmem>>, %arg5: memref<3x3x64x4xbf16, #tpu.memory_space<vmem>>, %arg6: memref<1x4xf32, #tpu.memory_space<vmem>>, %arg7: memref<1x1xf32, #tpu.memory_space<smem>>, %arg8: memref<1x1x4x4xbf16, #tpu.memory_space<vmem>>, %arg9: memref<1x1x4x4xf32, #tpu.memory_space<vmem>>) attributes {dimension_semantics = [#tpu.dimension_semantics<parallel>, #tpu.dimension_semantics<parallel>], iteration_bounds = array<i64: 2, 4>, scalar_prefetch = 0 : i64, scratch_operands = 0 : i64, tpu.core_type = #tpu.core_type<tc>, window_params = [{transform_indices = @transform_0, window_bounds = array<i64: 1, 1, 6, 64>}, {transform_indices = @transform_1, window_bounds = array<i64: 1, 1, 6, 64>}, {transform_indices = @transform_2, window_bounds = array<i64: 1, 1, 6, 64>}, {pipeline_mode = #tpu.pipeline_mode<synchronous>, transform_indices = @transform_3, window_bounds = array<i64: 3, 3, 64, 4>}, {pipeline_mode = #tpu.pipeline_mode<synchronous>, transform_indices = @transform_4, window_bounds = array<i64: 1, 4>}, {transform_indices = @transform_5, window_bounds = array<i64: 1, 1>}, {transform_indices = @transform_6, window_bounds = array<i64: 1, 1, 4, 4>}, {transform_indices = @transform_7, window_bounds = array<i64: 1, 1, 4, 4>}]} {
    %c0 = arith.constant 0 : index
    %c0_0 = arith.constant 0 : index
    %c0_1 = arith.constant 0 : index
    %c0_2 = arith.constant 0 : index
    %0 = vector.load %arg2[%c0, %c0_0, %c0_1, %c0_2] : memref<1x1x6x64xbf16, #tpu.memory_space<vmem>>, vector<1x1x6x64xbf16>
    %1 = vector.shape_cast %0 : vector<1x1x6x64xbf16> to vector<6x64xbf16>
    %2 = vector.extract_strided_slice %1 {offsets = [0, 0], sizes = [4, 64], strides = [1, 1]} : vector<6x64xbf16> to vector<4x64xbf16>
    %c0_3 = arith.constant 0 : index
    %c0_4 = arith.constant 0 : index
    %c0_5 = arith.constant 0 : index
    %c0_6 = arith.constant 0 : index
    %3 = vector.load %arg5[%c0_3, %c0_4, %c0_5, %c0_6] : memref<3x3x64x4xbf16, #tpu.memory_space<vmem>>, vector<1x1x64x4xbf16>
    %4 = vector.shape_cast %3 : vector<1x1x64x4xbf16> to vector<64x4xbf16>
    %cst = arith.constant dense<0.000000e+00> : vector<4x4xf32>
    %5 = tpu.matmul %2, %4, %cst {dimension_numbers = #tpu.dot_dimension_numbers<[1], [0], [0], [1], [0, 0, 1, 1], [], []>} : vector<4x64xbf16>, vector<64x4xbf16>, vector<4x4xf32> -> vector<4x4xf32>
    %6 = vector.extract_strided_slice %1 {offsets = [1, 0], sizes = [4, 64], strides = [1, 1]} : vector<6x64xbf16> to vector<4x64xbf16>
    %c0_7 = arith.constant 0 : index
    %c1 = arith.constant 1 : index
    %c0_8 = arith.constant 0 : index
    %c0_9 = arith.constant 0 : index
    %7 = vector.load %arg5[%c0_7, %c1, %c0_8, %c0_9] : memref<3x3x64x4xbf16, #tpu.memory_space<vmem>>, vector<1x1x64x4xbf16>
    %8 = vector.shape_cast %7 : vector<1x1x64x4xbf16> to vector<64x4xbf16>
    %cst_10 = arith.constant dense<0.000000e+00> : vector<4x4xf32>
    %9 = tpu.matmul %6, %8, %cst_10 {dimension_numbers = #tpu.dot_dimension_numbers<[1], [0], [0], [1], [0, 0, 1, 1], [], []>} : vector<4x64xbf16>, vector<64x4xbf16>, vector<4x4xf32> -> vector<4x4xf32>
    %10 = arith.addf %5, %9 : vector<4x4xf32>
    %11 = vector.extract_strided_slice %1 {offsets = [2, 0], sizes = [4, 64], strides = [1, 1]} : vector<6x64xbf16> to vector<4x64xbf16>
    %c0_11 = arith.constant 0 : index
    %c2 = arith.constant 2 : index
    %c0_12 = arith.constant 0 : index
    %c0_13 = arith.constant 0 : index
    %12 = vector.load %arg5[%c0_11, %c2, %c0_12, %c0_13] : memref<3x3x64x4xbf16, #tpu.memory_space<vmem>>, vector<1x1x64x4xbf16>
    %13 = vector.shape_cast %12 : vector<1x1x64x4xbf16> to vector<64x4xbf16>
    %cst_14 = arith.constant dense<0.000000e+00> : vector<4x4xf32>
    %14 = tpu.matmul %11, %13, %cst_14 {dimension_numbers = #tpu.dot_dimension_numbers<[1], [0], [0], [1], [0, 0, 1, 1], [], []>} : vector<4x64xbf16>, vector<64x4xbf16>, vector<4x4xf32> -> vector<4x4xf32>
    %15 = arith.addf %10, %14 : vector<4x4xf32>
    %c0_15 = arith.constant 0 : index
    %c0_16 = arith.constant 0 : index
    %c0_17 = arith.constant 0 : index
    %c0_18 = arith.constant 0 : index
    %16 = vector.load %arg3[%c0_15, %c0_16, %c0_17, %c0_18] : memref<1x1x6x64xbf16, #tpu.memory_space<vmem>>, vector<1x1x6x64xbf16>
    %17 = vector.shape_cast %16 : vector<1x1x6x64xbf16> to vector<6x64xbf16>
    %18 = vector.extract_strided_slice %17 {offsets = [0, 0], sizes = [4, 64], strides = [1, 1]} : vector<6x64xbf16> to vector<4x64xbf16>
    %c1_19 = arith.constant 1 : index
    %c0_20 = arith.constant 0 : index
    %c0_21 = arith.constant 0 : index
    %c0_22 = arith.constant 0 : index
    %19 = vector.load %arg5[%c1_19, %c0_20, %c0_21, %c0_22] : memref<3x3x64x4xbf16, #tpu.memory_space<vmem>>, vector<1x1x64x4xbf16>
    %20 = vector.shape_cast %19 : vector<1x1x64x4xbf16> to vector<64x4xbf16>
    %cst_23 = arith.constant dense<0.000000e+00> : vector<4x4xf32>
    %21 = tpu.matmul %18, %20, %cst_23 {dimension_numbers = #tpu.dot_dimension_numbers<[1], [0], [0], [1], [0, 0, 1, 1], [], []>} : vector<4x64xbf16>, vector<64x4xbf16>, vector<4x4xf32> -> vector<4x4xf32>
    %22 = arith.addf %15, %21 : vector<4x4xf32>
    %23 = vector.extract_strided_slice %17 {offsets = [1, 0], sizes = [4, 64], strides = [1, 1]} : vector<6x64xbf16> to vector<4x64xbf16>
    %c1_24 = arith.constant 1 : index
    %c1_25 = arith.constant 1 : index
    %c0_26 = arith.constant 0 : index
    %c0_27 = arith.constant 0 : index
    %24 = vector.load %arg5[%c1_24, %c1_25, %c0_26, %c0_27] : memref<3x3x64x4xbf16, #tpu.memory_space<vmem>>, vector<1x1x64x4xbf16>
    %25 = vector.shape_cast %24 : vector<1x1x64x4xbf16> to vector<64x4xbf16>
    %cst_28 = arith.constant dense<0.000000e+00> : vector<4x4xf32>
    %26 = tpu.matmul %23, %25, %cst_28 {dimension_numbers = #tpu.dot_dimension_numbers<[1], [0], [0], [1], [0, 0, 1, 1], [], []>} : vector<4x64xbf16>, vector<64x4xbf16>, vector<4x4xf32> -> vector<4x4xf32>
    %27 = arith.addf %22, %26 : vector<4x4xf32>
    %28 = vector.extract_strided_slice %17 {offsets = [2, 0], sizes = [4, 64], strides = [1, 1]} : vector<6x64xbf16> to vector<4x64xbf16>
    %c1_29 = arith.constant 1 : index
    %c2_30 = arith.constant 2 : index
    %c0_31 = arith.constant 0 : index
    %c0_32 = arith.constant 0 : index
    %29 = vector.load %arg5[%c1_29, %c2_30, %c0_31, %c0_32] : memref<3x3x64x4xbf16, #tpu.memory_space<vmem>>, vector<1x1x64x4xbf16>
    %30 = vector.shape_cast %29 : vector<1x1x64x4xbf16> to vector<64x4xbf16>
    %cst_33 = arith.constant dense<0.000000e+00> : vector<4x4xf32>
    %31 = tpu.matmul %28, %30, %cst_33 {dimension_numbers = #tpu.dot_dimension_numbers<[1], [0], [0], [1], [0, 0, 1, 1], [], []>} : vector<4x64xbf16>, vector<64x4xbf16>, vector<4x4xf32> -> vector<4x4xf32>
    %32 = arith.addf %27, %31 : vector<4x4xf32>
    %c0_34 = arith.constant 0 : index
    %c0_35 = arith.constant 0 : index
    %c0_36 = arith.constant 0 : index
    %c0_37 = arith.constant 0 : index
    %33 = vector.load %arg4[%c0_34, %c0_35, %c0_36, %c0_37] : memref<1x1x6x64xbf16, #tpu.memory_space<vmem>>, vector<1x1x6x64xbf16>
    %34 = vector.shape_cast %33 : vector<1x1x6x64xbf16> to vector<6x64xbf16>
    %35 = vector.extract_strided_slice %34 {offsets = [0, 0], sizes = [4, 64], strides = [1, 1]} : vector<6x64xbf16> to vector<4x64xbf16>
    %c2_38 = arith.constant 2 : index
    %c0_39 = arith.constant 0 : index
    %c0_40 = arith.constant 0 : index
    %c0_41 = arith.constant 0 : index
    %36 = vector.load %arg5[%c2_38, %c0_39, %c0_40, %c0_41] : memref<3x3x64x4xbf16, #tpu.memory_space<vmem>>, vector<1x1x64x4xbf16>
    %37 = vector.shape_cast %36 : vector<1x1x64x4xbf16> to vector<64x4xbf16>
    %cst_42 = arith.constant dense<0.000000e+00> : vector<4x4xf32>
    %38 = tpu.matmul %35, %37, %cst_42 {dimension_numbers = #tpu.dot_dimension_numbers<[1], [0], [0], [1], [0, 0, 1, 1], [], []>} : vector<4x64xbf16>, vector<64x4xbf16>, vector<4x4xf32> -> vector<4x4xf32>
    %39 = arith.addf %32, %38 : vector<4x4xf32>
    %40 = vector.extract_strided_slice %34 {offsets = [1, 0], sizes = [4, 64], strides = [1, 1]} : vector<6x64xbf16> to vector<4x64xbf16>
    %c2_43 = arith.constant 2 : index
    %c1_44 = arith.constant 1 : index
    %c0_45 = arith.constant 0 : index
    %c0_46 = arith.constant 0 : index
    %41 = vector.load %arg5[%c2_43, %c1_44, %c0_45, %c0_46] : memref<3x3x64x4xbf16, #tpu.memory_space<vmem>>, vector<1x1x64x4xbf16>
    %42 = vector.shape_cast %41 : vector<1x1x64x4xbf16> to vector<64x4xbf16>
    %cst_47 = arith.constant dense<0.000000e+00> : vector<4x4xf32>
    %43 = tpu.matmul %40, %42, %cst_47 {dimension_numbers = #tpu.dot_dimension_numbers<[1], [0], [0], [1], [0, 0, 1, 1], [], []>} : vector<4x64xbf16>, vector<64x4xbf16>, vector<4x4xf32> -> vector<4x4xf32>
    %44 = arith.addf %39, %43 : vector<4x4xf32>
    %45 = vector.extract_strided_slice %34 {offsets = [2, 0], sizes = [4, 64], strides = [1, 1]} : vector<6x64xbf16> to vector<4x64xbf16>
    %c2_48 = arith.constant 2 : index
    %c2_49 = arith.constant 2 : index
    %c0_50 = arith.constant 0 : index
    %c0_51 = arith.constant 0 : index
    %46 = vector.load %arg5[%c2_48, %c2_49, %c0_50, %c0_51] : memref<3x3x64x4xbf16, #tpu.memory_space<vmem>>, vector<1x1x64x4xbf16>
    %47 = vector.shape_cast %46 : vector<1x1x64x4xbf16> to vector<64x4xbf16>
    %cst_52 = arith.constant dense<0.000000e+00> : vector<4x4xf32>
    %48 = tpu.matmul %45, %47, %cst_52 {dimension_numbers = #tpu.dot_dimension_numbers<[1], [0], [0], [1], [0, 0, 1, 1], [], []>} : vector<4x64xbf16>, vector<64x4xbf16>, vector<4x4xf32> -> vector<4x4xf32>
    %49 = arith.addf %44, %48 : vector<4x4xf32>
    %c0_53 = arith.constant 0 : index
    %c0_54 = arith.constant 0 : index
    %50 = vector.load %arg6[%c0_53, %c0_54] : memref<1x4xf32, #tpu.memory_space<vmem>>, vector<1x4xf32>
    %51 = vector.broadcast %50 : vector<1x4xf32> to vector<4x4xf32>
    %52 = arith.addf %49, %51 : vector<4x4xf32>
    %c0_55 = arith.constant 0 : index
    %c0_56 = arith.constant 0 : index
    %53 = memref.load %arg7[%c0_55, %c0_56] : memref<1x1xf32, #tpu.memory_space<smem>>
    %cst_57 = arith.constant 0.000000e+00 : f32
    %54 = vector.broadcast %cst_57 : f32 to vector<4x4xf32>
    %55 = arith.cmpf ogt, %52, %54 : vector<4x4xf32>
    %56 = vector.broadcast %53 : f32 to vector<4x4xf32>
    %57 = arith.mulf %56, %52 : vector<4x4xf32>
    %58 = arith.select %55, %52, %57 : vector<4x4xi1>, vector<4x4xf32>
    %c0_58 = arith.constant 0 : index
    %c0_59 = arith.constant 0 : index
    %c0_60 = arith.constant 0 : index
    %c0_61 = arith.constant 0 : index
    %59 = vector.load %arg8[%c0_58, %c0_59, %c0_60, %c0_61] : memref<1x1x4x4xbf16, #tpu.memory_space<vmem>>, vector<1x1x4x4xbf16>
    %60 = vector.shape_cast %59 : vector<1x1x4x4xbf16> to vector<4x4xbf16>
    %61 = arith.extf %60 : vector<4x4xbf16> to vector<4x4xf32>
    %62 = arith.addf %58, %61 : vector<4x4xf32>
    %c0_62 = arith.constant 0 : index
    %c0_63 = arith.constant 0 : index
    %c0_64 = arith.constant 0 : index
    %c0_65 = arith.constant 0 : index
    %63 = vector.load %arg9[%c0_62, %c0_63, %c0_64, %c0_65] : memref<1x1x4x4xf32, #tpu.memory_space<vmem>>, vector<1x1x4x4xf32>
    %64 = vector.shape_cast %63 : vector<1x1x4x4xf32> to vector<4x4xf32>
    %65 = vector.shape_cast %62 : vector<4x4xf32> to vector<1x1x4x4xf32>
    tpu.vector_store %arg9[%c0_62, %c0_63, %c0_64, %c0_65], %65 {strides = array<i32>} : memref<1x1x4x4xf32, #tpu.memory_space<vmem>>, vector<1x1x4x4xf32>,
    return
  }
  func.func @transform_0(%arg0: i32, %arg1: i32) -> (i32, i32, i32, i32) {
    %c0_i32 = arith.constant 0 : i32
    %0 = arith.addi %arg1, %c0_i32 : i32
    %c0_i32_0 = arith.constant 0 : i32
    %c0_i32_1 = arith.constant 0 : i32
    %c0_i32_2 = arith.constant 0 : i32
    return %arg0, %0, %c0_i32_0, %c0_i32_1 : i32, i32, i32, i32
  }
  func.func @transform_1(%arg0: i32, %arg1: i32) -> (i32, i32, i32, i32) {
    %c1_i32 = arith.constant 1 : i32
    %0 = arith.addi %arg1, %c1_i32 : i32
    %c0_i32 = arith.constant 0 : i32
    %c0_i32_0 = arith.constant 0 : i32
    %c0_i32_1 = arith.constant 0 : i32
    return %arg0, %0, %c0_i32, %c0_i32_0 : i32, i32, i32, i32
  }
  func.func @transform_2(%arg0: i32, %arg1: i32) -> (i32, i32, i32, i32) {
    %c2_i32 = arith.constant 2 : i32
    %0 = arith.addi %arg1, %c2_i32 : i32
    %c0_i32 = arith.constant 0 : i32
    %c0_i32_0 = arith.constant 0 : i32
    %c0_i32_1 = arith.constant 0 : i32
    return %arg0, %0, %c0_i32, %c0_i32_0 : i32, i32, i32, i32
  }
  func.func @transform_3(%arg0: i32, %arg1: i32) -> (i32, i32, i32, i32) {
    %c0_i32 = arith.constant 0 : i32
    %c0_i32_0 = arith.constant 0 : i32
    %c0_i32_1 = arith.constant 0 : i32
    %c0_i32_2 = arith.constant 0 : i32
    %c0_i32_3 = arith.constant 0 : i32
    return %c0_i32, %c0_i32_0, %c0_i32_1, %c0_i32_2 : i32, i32, i32, i32
  }
  func.func @transform_4(%arg0: i32, %arg1: i32) -> (i32, i32) {
    %c0_i32 = arith.constant 0 : i32
    %c0_i32_0 = arith.constant 0 : i32
    %c0_i32_1 = arith.constant 0 : i32
    return %c0_i32, %c0_i32_0 : i32, i32
  }
  func.func @transform_5(%arg0: i32, %arg1: i32) -> (i32, i32) {
    %c0_i32 = arith.constant 0 : i32
    %c0_i32_0 = arith.constant 0 : i32
    %c0_i32_1 = arith.constant 0 : i32
    return %c0_i32, %c0_i32_0 : i32, i32
  }
  func.func @transform_6(%arg0: i32, %arg1: i32) -> (i32, i32, i32, i32) {
    %c0_i32 = arith.constant 0 : i32
    %c0_i32_0 = arith.constant 0 : i32
    %c0_i32_1 = arith.constant 0 : i32
    return %arg0, %arg1, %c0_i32, %c0_i32_0 : i32, i32, i32, i32
  }
  func.func @transform_7(%arg0: i32, %arg1: i32) -> (i32, i32, i32, i32) {
    %c0_i32 = arith.constant 0 : i32
    %c0_i32_0 = arith.constant 0 : i32
    %c0_i32_1 = arith.constant 0 : i32
    return %arg0, %arg1, %c0_i32, %c0_i32_0 : i32, i32, i32, i32
  }
}

</mosaic_0001>

<bundles_post_ra>
// kernel: dblock_forward.3
= control target key start
LH: loop header
LB: loop body
LE: loop exit
PB: predicated region body
PF: predicated region fallthrough
CT: control target
= control target key end

     0   :  { %s1666_s23 = smov 0   ;;  %s1668_s24 = smov 0   ;;  %s1918_s0 = inlined_call_operand.vmem [shape: bf16[2,6,6,64], index: 0, kind: input, shape index: {}, may-alias: {0,1,2}]   ;;  %s1919_s1 = inlined_call_operand.vmem [shape: bf16[2,6,6,64], index: 1, kind: input, shape index: {}, may-alias: {0,1,2}]   ;;  %s1920_s2 = inlined_call_operand.vmem [shape: bf16[2,6,6,64], index: 2, kind: input, shape index: {}, may-alias: {0,1,2}]   ;;  %s1921_s3 = inlined_call_operand.vmem [shape: bf16[3,3,64,4], index: 3, kind: input, shape index: {}]   ;;  %s1922_s4 = inlined_call_operand.vmem [shape: f32[1,4], index: 4, kind: input, shape index: {}]   ;;  %s1923_s5 = inlined_call_operand.<no memory space> [shape: f32[1,1], index: 5, kind: input, shape index: {}]   ;;  %s1924_s6 = inlined_call_operand.vmem [shape: bf16[2,4,4,4], index: 6, kind: output, shape index: {}]  }
   0x1   :  { %11 = sst [smem:[#allocation2]] %s1923_s5  ;;  %s1670_s25 = smov 0  }
   0x2   :  { %s1672_s26 = smov 0   ;;  %s1674_s27 = smov 0  }
   0x3 LB: > { %s26_s5 = sadd.s32 1, %s1616_s25  ;;  %s29_s28 = sadd.s32 1, %s1620_s26  ;;  %s1624_s27 = sphi %s1674_s27, %s17_s27   ;;  %s1620_s26 = sphi %s1672_s26, %s1928_s26   ;;  %s1616_s25 = sphi %s1670_s25, %s1927_s25   ;;  %s1612_s24 = sphi %s1668_s24, %s1926_s24   ;;  %s1608_s23 = sphi %s1666_s23, %s1925_s23  }
   0x4   : > { %p27_p0 = scmp.ge.s32.totalorder %s26_s5, 4  ;;  %p1230_p1 = scmp.ge.s32.totalorder %s1624_s27, 1 }
   0x5   : > { %p270_p2 = scmp.lt.s32.totalorder %s1624_s27, 9 }
   0x6   : > { %s1930_s5 = smov (%p27_p0, %s26_s5), 0  ;;  %s1932_s28 = smov (!%p27_p0, %s29_s28), %s1620_s26 }
   0x7   : > { %p271_p3 = pnand %p1230_p1, %p270_p2  ;;  %p31_p4 = scmp.ge.s32.totalorder %s1932_s28, 2 }
   0x8   : > { %v1547_v0 = vld [vmem:[%s1921_s3 + $0x20] sm:$0xff] (!%p271_p3)   ;;  %v1626_v1 = vmov (!%p271_p3), 0.0   ;;  %v1549_v3 = vld [vmem:[%s1921_s3 + $0x28] sm:$0xff] (!%p271_p3)   ;;  %vm1627_vm0 = vmmov (!%p271_p3), 0   ;;  %p324_p5 = scmp.lt.s32.totalorder (!%p271_p3), %s1612_s24, 1  ;;  %p326_p6 = scmp.lt.s32.totalorder (!%p271_p3), %s1608_s23, 5 }
   0x9   : > { %s1934_s28 = smov (%p31_p4, %s1932_s28), 0  ;;  %274 = sbr.rel (%p271_p3) target bundleno = 318 (0x13e), region = 44 }
   0xa   : > { %1396 = vmatprep.subr.bf16.mxu0 (!%p271_p3), %v1626_v1  ;;  %1408 = vmatprep.subr.bf16.mxu1 (!%p271_p3), %v1626_v1  ;;  %v1548_v2 = vld [vmem:[%s1921_s3] sm:$0xff] (!%p271_p3)   ;;  %v1550_v4 = vld [vmem:[%s1921_s3 + $0x8] sm:$0xff] (!%p271_p3)   ;;  %v1551_v5 = vld [vmem:[%s1921_s3 + $0x30] sm:$0xff] (!%p271_p3)   ;;  %s332_s10 = sadd.s32 (!%p271_p3), 1, %s1608_s23  ;;  %vm413_vm1 = vcmask (!%p271_p3), 523264   ;;  %p354_p9 = scmp.lt.s32.totalorder (!%p271_p3), %s1608_s23, 3 }
   0xb   : > { %1397 = vmatpush3.bf16.msra.mxu0 (!%p271_p3), %v1547_v0  ;;  %1404 = vmatprep.mubr.msk.bf16.mxu0 (!%p271_p3), %vm1627_vm0, %v1626_v1  ;;  %v1552_v6 = vld [vmem:[%s1921_s3 + $0x10] sm:$0xff] (!%p271_p3)   ;;  %v1553_v7 = vld [vmem:[%s1921_s3 + $0x38] sm:$0xff] (!%p271_p3)   ;;  %p335_p7 = scmp.lt.s32.totalorder (!%p271_p3), %s332_s10, 5  ;;  %v1557_v13 = vld [vmem:[%s1921_s3 + $0x60] sm:$0xff] (!%p271_p3)   ;;  %s1096_s8 = sld [smem:[#allocation2]] (!%p271_p3)  ;;  %vm1102_vm3 = vcmask (!%p271_p3), 25600  }
   0xc   : > { %1409 = vmatpush3.bf16.msra.mxu1 (!%p271_p3), %v1548_v2  ;;  %1398 = vmatprep.subr.bf16.mxu0 (!%p271_p3), %v1626_v1  ;;  %v1554_v8 = vld [vmem:[%s1921_s3 + $0x18] sm:$0xff] (!%p271_p3)   ;;  %v1556_v15 = vld [vmem:[%s1921_s3 + $0x40] sm:$0xff] (!%p271_p3)   ;;  %v1559_v17 = vld [vmem:[%s1921_s3 + $0x68] sm:$0xff] (!%p271_p3)  }
   0xd   : > { %1410 = vmatprep.subr.bf16.mxu1 (!%p271_p3), %v1626_v1  ;;  %1416 = vmatprep.mubr.msk.bf16.mxu1 (!%p271_p3), %vm1627_vm0, %v1626_v1  ;;  %v1558_v18 = vld [vmem:[%s1921_s3 + $0x48] sm:$0xff] (!%p271_p3)   ;;  %v1561_v19 = vld [vmem:[%s1921_s3 + $0x70] sm:$0xff] (!%p271_p3)   ;;  %v1563_v21 = vld [vmem:[%s1921_s3 + $0x78] sm:$0xff] (!%p271_p3)  }
   0xe   : > { %v1560_v20 = vld [vmem:[%s1921_s3 + $0x50] sm:$0xff] (!%p271_p3)   ;;  %v1562_v22 = vld [vmem:[%s1921_s3 + $0x58] sm:$0xff] (!%p271_p3)   ;;  %v1566_v23 = vld [vmem:[%s1921_s3 + $0xa0] sm:$0xff] (!%p271_p3)  }
   0xf   : > { %1399 = vmatpush3.bf16.msra.mxu0 (!%p271_p3), %v1549_v3  ;;  %v1564_v26 = vld [vmem:[%s1921_s3 + $0x80] sm:$0xff] (!%p271_p3)   ;;  %v1568_v27 = vld [vmem:[%s1921_s3 + $0xa8] sm:$0xff] (!%p271_p3)   ;;  %v1570_v30 = vld [vmem:[%s1921_s3 + $0xb0] sm:$0xff] (!%p271_p3)  }
  0x10   : > { %s1936_s24 = smov (!%p324_p5, %s1612_s24), 1  ;;  %1411 = vmatpush3.bf16.msra.mxu1 %v1550_v4  ;;  %1400 = vmatprep.subr.bf16.mxu0 %v1626_v1  ;;  %s1938_s10 = smov (!%p335_p7, %s332_s10), 5  ;;  %v1567_v29 = vld [vmem:[%s1921_s3 + $0x88] sm:$0xff]   ;;  %v1569_v32 = vld [vmem:[%s1921_s3 + $0x90] sm:$0xff]   ;;  %v1572_v33 = vld [vmem:[%s1921_s3 + $0xb8] sm:$0xff]  }
  0x11   : > { %s327_s13 = scalar_select %p326_p6, %s1608_s23, 5  ;;  %1412 = vmatprep.subr.bf16.mxu1 %v1626_v1  ;;  %v1571_v36 = vld [vmem:[%s1921_s3 + $0x98] sm:$0xff]   ;;  %v1574_v38 = vld [vmem:[%s1921_s3 + $0xe0] sm:$0xff]   ;;  %v1576_v43 = vld [vmem:[%s1921_s3 + $0xe8] sm:$0xff]  }
  0x12   : > { %s1730_s16 = smul.u32 6, %s1936_s24  ;;  %v1573_v41 = vld [vmem:[%s1921_s3 + $0xc0] sm:$0xff]   ;;  %v1575_v44 = vld [vmem:[%s1921_s3 + $0xc8] sm:$0xff]   ;;  %v1578_v46 = vld [vmem:[%s1921_s3 + $0xf0] sm:$0xff]  }
  0x13   : > { %1401 = vmatpush3.bf16.msra.mxu0 %v1551_v5  ;;  %v1577_v47 = vld [vmem:[%s1921_s3 + $0xd0] sm:$0xff]   ;;  %v1580_v50 = vld [vmem:[%s1921_s3 + $0xf8] sm:$0xff]   ;;  %v1582_v53 = vld [vmem:[%s1921_s3 + $0x100] sm:$0xff]  }
  0x14   : > { %s329_s19 = sadd.s32 %s1730_s16, %s327_s13  ;;  %1413 = vmatpush3.bf16.msra.mxu1 %v1552_v6  ;;  %1402 = vmatprep.subr.bf16.mxu0 %v1626_v1  ;;  %s338_s20 = sadd.s32 %s1730_s16, %s1938_s10  ;;  %v1579_v51 = vld [vmem:[%s1921_s3 + $0xd8] sm:$0xff]   ;;  %v1583_v54 = vld [vmem:[%s1921_s3 + $0x108] sm:$0xff]   ;;  %v1584_v55 = vld [vmem:[%s1921_s3 + $0x110] sm:$0xff]  }
  0x15   : > { %s1231_s22 = sshll.u32 %s329_s19, 2  ;;  %1414 = vmatprep.subr.bf16.mxu1 %v1626_v1  ;;  %s1232_s7 = sshll.u32 %s338_s20, 2  ;;  %v1585_v56 = vld [vmem:[%s1921_s3 + $0x118] sm:$0xff]  }
  0x16   : > { %s331_s9 = scalar_lea.vmem %s1918_s0, %s1231_s22  ;;  %s342_s10 = sadd.s32 2, %s1608_s23 }
  0x17   : > { %v361_v9 = vld [vmem:[%s331_s9] sm:$0x7]  ;;  %1403 = vmatpush3.bf16.msra.mxu0 %v1553_v7  ;;  %s340_s13 = scalar_lea.vmem %s1919_s1, %s1232_s7  ;;  %p345_p8 = scmp.lt.s32.totalorder %s342_s10, 5 }
  0x18   : > { %v1244_v10 = vcombine.low %v361_v9, %v361_v9  ;;  %1415 = vmatpush3.bf16.msra.mxu1 %v1554_v8  ;;  %1420 = vmatprep.subr.bf16.mxu0 %v1626_v1  ;;  %v602_v24 = vld [vmem:[%s340_s13] sm:$0x7]  ;;  %s1942_s23 = smov (!%p354_p9, %s1608_s23), 3  ;;  %s1234_s9 = sshll.u32 %s1936_s24, 2 }
  0x19   : > { %1432 = vmatprep.subr.bf16.mxu1 %v1626_v1  ;;  %s1940_s10 = smov (!%p345_p8, %s342_s10), 5  ;;  %v1289_v28 = vcombine.low %v602_v24, %v602_v24 }
  0x1a   : > { %v383_v11 = vshrl.u32 %v1244_v10, 16  ;;  %v385_v12 = vshll.u32 %v1244_v10, 16  ;;  %v533_v25 = vrot.slane %v1244_v10, 1  ;;  %s348_s7 = sadd.s32 %s1730_s16, %s1940_s10 }
  0x1b   : > { %1417 = vmatmul.mubr.msk.bf16.vlgmr.msra.gmra.mrb[0].mxu1 %vm413_vm1, %v361_v9  ;;  %v695_v31 = vshll.u32 %v1289_v28, 16  ;;  %s1233_s13 = sshll.u32 %s348_s7, 2  ;;  %v693_v34 = vshrl.u32 %v1289_v28, 16  ;;  %v776_v37 = vrot.slane %v1289_v28, 1 }
  0x1c   : > { %v387_v14 = vrot.slane %v385_v12, 1  ;;  %1433 = vmatpush3.bf16.msra.mxu1 %v1557_v13  ;;  %1440 = vmatprep.mubr.msk.bf16.mxu1 %vm1627_vm0, %v1626_v1  ;;  %s350_s17 = scalar_lea.vmem %s1920_s2, %s1233_s13  ;;  %s357_s13 = sadd.s32 %s1234_s9, %s1942_s23 }
  0x1d   : > { %1434 = vmatprep.subr.bf16.mxu1 %v1626_v1  ;;  %v697_v35 = vrot.slane %v695_v31, 1  ;;  %v845_v39 = vld [vmem:[%s350_s17] sm:$0x7]  ;;  %s1235_s14 = sshll.u32 %s357_s13, 1 }
  0x1e   : > { %v388_v16 = vor.u32 %v387_v14, %v383_v11  ;;  %v1329_v42 = vcombine.low %v845_v39, %v845_v39  ;;  %s359_s10 = scalar_lea.vmem %s1924_s6, %s1235_s14 }
  0x1f   : > { %v698_v40 = vor.u32 %v697_v35, %v693_v34  ;;  %v1348_v34 = vld [vmem:[%s1922_s4] ss:$0 sm:$0xff] }
  0x20   : > { %1405 = vmatmul.mubr.msk.bf16.vlgmr.msra.gmra.mrb[0].mxu0 %vm413_vm1, %v388_v16  ;;  %1435 = vmatpush3.bf16.msra.mxu1 %v1559_v17  ;;  %v938_v45 = vshll.u32 %v1329_v42, 16  ;;  %v936_v48 = vshrl.u32 %v1329_v42, 16  ;;  %v1019_v57 = vrot.slane %v1329_v42, 1 }
  0x21   : > { %1421 = vmatpush3.bf16.msra.mxu0 %v1556_v15  ;;  %1428 = vmatprep.mubr.msk.bf16.mxu0 %vm1627_vm0, %v1626_v1 }
  0x22   : > { %1422 = vmatprep.subr.bf16.mxu0 %v1626_v1  ;;  %1436 = vmatprep.subr.bf16.mxu1 %v1626_v1  ;;  %v940_v49 = vrot.slane %v938_v45, 1 }
  0x24   : > { %1437 = vmatpush3.bf16.msra.mxu1 %v1561_v19  ;;  %v941_v52 = vor.u32 %v940_v49, %v936_v48 }
  0x25   : > { %1423 = vmatpush3.bf16.msra.mxu0 %v1558_v18  ;;  %1438 = vmatprep.subr.bf16.mxu1 %v1626_v1 }
  0x26   : > { %1424 = vmatprep.subr.bf16.mxu0 %v1626_v1 }
  0x28   : > { %1439 = vmatpush3.bf16.msra.mxu1 %v1563_v21 }
  0x29   : > { %1425 = vmatpush3.bf16.msra.mxu0 %v1560_v20  ;;  %1456 = vmatprep.subr.bf16.mxu1 %v1626_v1 }
  0x2a   : > { %1426 = vmatprep.subr.bf16.mxu0 %v1626_v1 }
  0x2b   : > { %1441 = vmatmul.mubr.msk.bf16.vlgmr.msra.gmra.mrb[4].mxu1 %vm413_vm1, %v602_v24 }
  0x2c   : > { %1457 = vmatpush3.bf16.msra.mxu1 %v1566_v23  ;;  %1464 = vmatprep.mubr.msk.bf16.mxu1 %vm1627_vm0, %v1626_v1 }
  0x2d   : > { %1427 = vmatpush3.bf16.msra.mxu0 %v1562_v22  ;;  %1458 = vmatprep.subr.bf16.mxu1 %v1626_v1 }
  0x2e   : > { %1444 = vmatprep.subr.bf16.mxu0 %v1626_v1 }
  0x30   : > { %1429 = vmatmul.mubr.msk.bf16.vlgmr.msra.gmra.mrb[4].mxu0 %vm413_vm1, %v533_v25  ;;  %1459 = vmatpush3.bf16.msra.mxu1 %v1568_v27 }
  0x31   : > { %1445 = vmatpush3.bf16.msra.mxu0 %v1564_v26  ;;  %1452 = vmatprep.mubr.msk.bf16.mxu0 %vm1627_vm0, %v1626_v1 }
  0x32   : > { %1446 = vmatprep.subr.bf16.mxu0 %v1626_v1  ;;  %1460 = vmatprep.subr.bf16.mxu1 %v1626_v1 }
  0x34   : > { %1461 = vmatpush3.bf16.msra.mxu1 %v1570_v30 }
  0x35   : > { %1447 = vmatpush3.bf16.msra.mxu0 %v1567_v29  ;;  %1462 = vmatprep.subr.bf16.mxu1 %v1626_v1 }
  0x36   : > { %1448 = vmatprep.subr.bf16.mxu0 %v1626_v1 }
  0x38   : > { %1463 = vmatpush3.bf16.msra.mxu1 %v1572_v33 }
  0x39   : > { %1449 = vmatpush3.bf16.msra.mxu0 %v1569_v32  ;;  %1480 = vmatprep.subr.bf16.mxu1 %v1626_v1 }
  0x3a   : > { %1450 = vmatprep.subr.bf16.mxu0 %v1626_v1 }
  0x3b   : > { %1465 = vmatmul.mubr.msk.bf16.vlgmr.msra.gmra.mrb[8].mxu1 %vm413_vm1, %v776_v37  ;;  %v1098_v37 = vstv %s1096_s8 }
  0x3c   : > { %1481 = vmatpush3.bf16.msra.mxu1 %v1574_v38  ;;  %1488 = vmatprep.mubr.msk.bf16.mxu1 %vm1627_vm0, %v1626_v1 }
  0x3d   : > { %1451 = vmatpush3.bf16.msra.mxu0 %v1571_v36  ;;  %1482 = vmatprep.subr.bf16.mxu1 %v1626_v1 }
  0x3e   : > { %1468 = vmatprep.subr.bf16.mxu0 %v1626_v1 }
  0x40   : > { %1453 = vmatmul.mubr.msk.bf16.vlgmr.msra.gmra.mrb[8].mxu0 %vm413_vm1, %v698_v40  ;;  %1483 = vmatpush3.bf16.msra.mxu1 %v1576_v43 }
  0x41   : > { %1469 = vmatpush3.bf16.msra.mxu0 %v1573_v41  ;;  %1476 = vmatprep.mubr.msk.bf16.mxu0 %vm1627_vm0, %v1626_v1 }
  0x42   : > { %1470 = vmatprep.subr.bf16.mxu0 %v1626_v1  ;;  %1484 = vmatprep.subr.bf16.mxu1 %v1626_v1 }
  0x44   : > { %1485 = vmatpush3.bf16.msra.mxu1 %v1578_v46 }
  0x45   : > { %1471 = vmatpush3.bf16.msra.mxu0 %v1575_v44  ;;  %1486 = vmatprep.subr.bf16.mxu1 %v1626_v1 }
  0x46   : > { %1472 = vmatprep.subr.bf16.mxu0 %v1626_v1 }
  0x48   : > { %1487 = vmatpush3.bf16.msra.mxu1 %v1580_v50 }
  0x49   : > { %1473 = vmatpush3.bf16.msra.mxu0 %v1577_v47 }
  0x4a   : > { %1474 = vmatprep.subr.bf16.mxu0 %v1626_v1 }
  0x4b   : > { %1489 = vmatmul.mubr.msk.bf16.vlgmr.msra.gmra.mrb[12].mxu1 %vm413_vm1, %v941_v52 }
  0x4d   : > { %1475 = vmatpush3.bf16.msra.mxu0 %v1579_v51 }
  0x4e   : > { %1492 = vmatprep.subr.bf16.mxu0 %v1626_v1 }
  0x50   : > { %1477 = vmatmul.mubr.msk.bf16.vlgmr.msra.gmra.mrb[12].mxu0 %vm413_vm1, %v845_v39 }
  0x51   : > { %1493 = vmatpush3.bf16.msra.mxu0 %v1582_v53  ;;  %1500 = vmatprep.mubr.msk.bf16.mxu0 %vm1627_vm0, %v1626_v1 }
  0x52   : > { %1494 = vmatprep.subr.bf16.mxu0 %v1626_v1 }
  0x55   : > { %1495 = vmatpush3.bf16.msra.mxu0 %v1583_v54 }
  0x56   : > { %1496 = vmatprep.subr.bf16.mxu0 %v1626_v1 }
  0x59   : > { %1497 = vmatpush3.bf16.msra.mxu0 %v1584_v55 }
  0x5a   : > { %1498 = vmatprep.subr.bf16.mxu0 %v1626_v1 }
  0x5d   : > { %1499 = vmatpush3.bf16.msra.mxu0 %v1585_v56 }
  0x60   : > { %1501 = vmatmul.mubr.msk.bf16.vlgmr.msra.gmra.mrb[16].mxu0 %vm413_vm1, %v1019_v57 }
  0xee   : > { %v518_v58 = vpop.f32.mrb[0].mxu1 }
  0xef   : > { %v1418_v59 = vpop.f32.mrb[1].mxu1 }
  0xf0   : > { %v521_v61 = vpop.f32.mrb[2].mxu1 }
  0xf1   : > { %v1419_v0 = vpop.f32.mrb[3].mxu1 }
  0xf3   : > { %v451_v60 = vpop.f32.mrb[0].mxu0 }
  0xf4   : > { %v1406_v62 = vpop.f32.mrb[1].mxu0  ;;  %v519_v63 = vadd.f32 %v518_v58, %v451_v60 }
  0xf5   : > { %v454_v2 = vpop.f32.mrb[2].mxu0 }
  0xf6   : > { %v1407_v3 = vpop.f32.mrb[3].mxu0 }
  0xfe   : > { %v673_v4 = vpop.f32.mrb[4].mxu1 }
  0xff   : > { %v1442_v5 = vpop.f32.mrb[5].mxu1 }
 0x100   : > { %v676_v7 = vpop.f32.mrb[6].mxu1 }
 0x101   : > { %v1443_v1 = vpop.f32.mrb[7].mxu1 }
 0x103   : > { %v595_v6 = vpop.f32.mrb[4].mxu0 }
 0x104   : > { %v601_v8 = vadd.f32 %v595_v6, %v519_v63  ;;  %v1430_v9 = vpop.f32.mrb[5].mxu0 }
 0x105   : > { %v598_v10 = vpop.f32.mrb[6].mxu0 }
 0x106   : > { %v679_v11 = vadd.f32 %v673_v4, %v601_v8  ;;  %v1431_v12 = vpop.f32.mrb[7].mxu0 }
 0x10e   : > { %v838_v13 = vpop.f32.mrb[8].mxu1 }
 0x10f   : > { %v1466_v14 = vpop.f32.mrb[9].mxu1 }
 0x110   : > { %v841_v16 = vpop.f32.mrb[10].mxu1 }
 0x111   : > { %v1467_v19 = vpop.f32.mrb[11].mxu1 }
 0x113   : > { %v760_v15 = vpop.f32.mrb[8].mxu0 }
 0x114   : > { %v766_v17 = vadd.f32 %v760_v15, %v679_v11  ;;  %v1454_v18 = vpop.f32.mrb[9].mxu0 }
 0x115   : > { %v763_v20 = vpop.f32.mrb[10].mxu0 }
 0x116   : > { %v844_v21 = vadd.f32 %v838_v13, %v766_v17  ;;  %v1455_v22 = vpop.f32.mrb[11].mxu0 }
 0x11e   : > { %v1003_v23 = vpop.f32.mrb[12].mxu1 }
 0x11f   : > { %v1490_v24 = vpop.f32.mrb[13].mxu1 }
 0x120   : > { %v1006_v26 = vpop.f32.mrb[14].mxu1 }
 0x121   : > { %v1491_v29 = vpop.f32.mrb[15].mxu1 }
 0x123   : > { %v916_v25 = vpop.f32.mrb[12].mxu0 }
 0x124   : > { %v922_v27 = vadd.f32 %v916_v25, %v844_v21  ;;  %v1478_v28 = vpop.f32.mrb[13].mxu0 }
 0x125   : > { %v919_v30 = vpop.f32.mrb[14].mxu0 }
 0x126   : > { %v1009_v31 = vadd.f32 %v1003_v23, %v922_v27  ;;  %v1479_v32 = vpop.f32.mrb[15].mxu0 }
 0x133   : > { %v1081_v33 = vpop.f32.mrb[16].mxu0 }
 0x134   : > { %v1087_v35 = vadd.f32 %v1081_v33, %v1009_v31  ;;  %v1502_v36 = vpop.f32.mrb[17].mxu0 }
 0x135   : > { %v1084_v38 = vpop.f32.mrb[18].mxu0 }
 0x136   : > { %v1095_v39 = vadd.f32 %v1348_v34, %v1087_v35  ;;  %v1503_v40 = vpop.f32.mrb[19].mxu0 }
 0x138   : > { %vm1097_vm2 = vcmp.gt.f32.partialorder %v1095_v39, 0.0  ;;  %v1099_v41 = vmul.f32 %v1098_v37, %v1095_v39 }
 0x13a   : > { %v1100_v42 = vsel %vm1097_vm2, %v1095_v39, %v1099_v41 }
 0x13b   : > { %v1101_v43 = vpack.c.bf16 %v1100_v42, %v1100_v42 }
 0x13d   : > { %1103 = vst.msk [vmem:[%s359_s10] sm:$0x3] %vm1102_vm3, %v1101_v43 }
 0x13e PF: > { %s17_s27 = sadd.s32 1, %s1624_s27   ;;  %s1925_s23 = smov %s1616_s25 }
 0x13f   : > { %p14_p10 = scmp.ge.s32.totalorder %s17_s27, 10   ;;  %s1926_s24 = smov %s1620_s26 }
 0x140   : > { %s1927_s25 = smov %s1930_s5  ;;  %s1928_s26 = smov %s1934_s28 }
 0x141   :  { %16 = sbr.rel (!%p14_p10) target bundleno = 3 (0x3), region = 88 }

// kernel: dblock_forward.4
= control target key start
LH: loop header
LB: loop body
LE: loop exit
PB: predicated region body
PF: predicated region fallthrough
CT: control target
= control target key end

     0   :  { %s1292_s26 = smov 0   ;;  %s1294_s27 = smov 0   ;;  %s1443_s0 = inlined_call_operand.vmem [shape: bf16[2,6,6,4], index: 0, kind: input, shape index: {}, may-alias: {0,1,2}]   ;;  %s1444_s1 = inlined_call_operand.vmem [shape: bf16[2,6,6,4], index: 1, kind: input, shape index: {}, may-alias: {0,1,2}]   ;;  %s1445_s2 = inlined_call_operand.vmem [shape: bf16[2,6,6,4], index: 2, kind: input, shape index: {}, may-alias: {0,1,2}]   ;;  %s1446_s3 = inlined_call_operand.vmem [shape: bf16[3,3,4,64], index: 3, kind: input, shape index: {}]   ;;  %s1447_s4 = inlined_call_operand.vmem [shape: f32[1,64], index: 4, kind: input, shape index: {}]   ;;  %s1448_s5 = inlined_call_operand.<no memory space> [shape: f32[1,1], index: 5, kind: input, shape index: {}]   ;;  %s1449_s6 = inlined_call_operand.vmem [shape: bf16[2,4,4,64], index: 6, kind: input, shape index: {}]   ;;  %s1450_s7 = inlined_call_operand.vmem [shape: bf16[2,4,4,64], index: 7, kind: output, shape index: {}]  }
   0x1   :  { %12 = sst [smem:[#allocation2]] %s1448_s5  ;;  %s1296_s28 = smov 0  }
   0x2   :  { %s1298_s29 = smov 0   ;;  %s1300_s30 = smov 0  }
   0x3 LB: > { %s27_s5 = sadd.s32 1, %s1237_s28  ;;  %s30_s8 = sadd.s32 1, %s1241_s29  ;;  %s1245_s30 = sphi %s1300_s30, %s18_s30   ;;  %s1241_s29 = sphi %s1298_s29, %s1454_s29   ;;  %s1237_s28 = sphi %s1296_s28, %s1453_s28   ;;  %s1233_s27 = sphi %s1294_s27, %s1452_s27   ;;  %s1229_s26 = sphi %s1292_s26, %s1451_s26  }
   0x4   : > { %p28_p0 = scmp.ge.s32.totalorder %s27_s5, 4  ;;  %p1058_p1 = scmp.ge.s32.totalorder %s1245_s30, 1 }
   0x5   : > { %p310_p2 = scmp.lt.s32.totalorder %s1245_s30, 9 }
   0x6   : > { %s1456_s5 = smov (%p28_p0, %s27_s5), 0  ;;  %s1458_s8 = smov (!%p28_p0, %s30_s8), %s1241_s29 }
   0x7   : > { %p311_p3 = pnand %p1058_p1, %p310_p2  ;;  %p32_p4 = scmp.ge.s32.totalorder %s1458_s8, 2 }
   0x8   : > { %v1066_v0 = vld [vmem:[%s1446_s3 + $0x2] sm:$0x3] (!%p311_p3)  ;;  %vm437_vm0 = vcmask (!%p311_p3), 1041408   ;;  %v420_v1 = vld [vmem:[%s1446_s3] sm:$0x3] (!%p311_p3)  ;;  %v1247_v2 = vmov (!%p311_p3), 0.0  }
   0x9   : > { %s1460_s8 = smov (%p32_p4, %s1458_s8), 0  ;;  %314 = sbr.rel (%p311_p3) target bundleno = 288 (0x120), region = 48 }
   0xa   : > { %1107 = vmatprep.subr.bf16.mxu0 (!%p311_p3), %v1247_v2  ;;  %v439_v3 = vsel (!%p311_p3), %vm437_vm0, %v1066_v0, 0  ;;  %1113 = vmatprep.subr.bf16.mxu1 (!%p311_p3), %v1247_v2  ;;  %v485_v4 = vsel (!%p311_p3), %vm437_vm0, %v420_v1, 0  ;;  %p374_p5 = scmp.lt.s32.totalorder (!%p311_p3), %s1233_s27, 1  ;;  %p376_p6 = scmp.lt.s32.totalorder (!%p311_p3), %s1229_s26, 5  ;;  %vm1248_vm1 = vmmov (!%p311_p3), 0   ;;  %vm433_vm2 = vcmask (!%p311_p3), 31744  }
   0xb   : > { %1108 = vmatpush3.bf16.msra.mxu0 (!%p311_p3), %v439_v3  ;;  %1114 = vmatpush3.bf16.msra.mxu1 (!%p311_p3), %v485_v4  ;;  %s382_s15 = sadd.s32 (!%p311_p3), 1, %s1229_s26  ;;  %v1072_v5 = vld [vmem:[%s1446_s3 + $0x6] sm:$0x3] (!%p311_p3)  ;;  %s392_s18 = sadd.s32 (!%p311_p3), 2, %s1229_s26  ;;  %v1070_v11 = vld [vmem:[%s1446_s3 + $0x4] sm:$0x3] (!%p311_p3) }
   0xc   : > { %1109 = vmatprep.mubr.msk.bf16.mxu0 (!%p311_p3), %vm1248_vm1, %v1247_v2  ;;  %1115 = vmatprep.mubr.msk.bf16.mxu1 (!%p311_p3), %vm1248_vm1, %v1247_v2  ;;  %p385_p7 = scmp.lt.s32.totalorder (!%p311_p3), %s382_s15, 5  ;;  %p395_p8 = scmp.lt.s32.totalorder (!%p311_p3), %s392_s18, 5  ;;  %v584_v6 = vsel (!%p311_p3), %vm437_vm0, %v1072_v5, 0  ;;  %v1077_v13 = vld [vmem:[%s1446_s3 + $0xa] sm:$0x3] (!%p311_p3)  ;;  %v534_v17 = vsel (!%p311_p3), %vm437_vm0, %v1070_v11, 0 }
   0xd   : > { %1119 = vmatprep.subr.bf16.mxu0 (!%p311_p3), %v1247_v2  ;;  %1125 = vmatprep.subr.bf16.mxu1 (!%p311_p3), %v1247_v2  ;;  %v693_v18 = vsel (!%p311_p3), %vm437_vm0, %v1077_v13, 0  ;;  %v1074_v21 = vld [vmem:[%s1446_s3 + $0x8] sm:$0x3] (!%p311_p3)  ;;  %v1081_v25 = vld [vmem:[%s1446_s3 + $0xe] sm:$0x3] (!%p311_p3)  ;;  %p404_p9 = scmp.lt.s32.totalorder (!%p311_p3), %s1229_s26, 3 }
   0xe   : > { %v643_v27 = vsel (!%p311_p3), %vm437_vm0, %v1074_v21, 0  ;;  %v802_v28 = vsel (!%p311_p3), %vm437_vm0, %v1081_v25, 0  ;;  %v1079_v33 = vld [vmem:[%s1446_s3 + $0xc] sm:$0x3] (!%p311_p3)  ;;  %v1084_v37 = vld [vmem:[%s1446_s3 + $0x10] sm:$0x3] (!%p311_p3) }
   0xf   : > { %v743_v36 = vsel (!%p311_p3), %vm437_vm0, %v1079_v33, 0  ;;  %v852_v38 = vsel (!%p311_p3), %vm437_vm0, %v1084_v37, 0  ;;  %vm912_vm4 = vcmask (!%p311_p3), 517120  }
  0x10   : > { %s1462_s27 = smov (!%p374_p5, %s1233_s27), 1  ;;  %s1464_s15 = smov (!%p385_p7, %s382_s15), 5 }
  0x11   : > { %s377_s13 = scalar_select %p376_p6, %s1229_s26, 5 }
  0x12   : > { %s1161_s14 = smul.u32 6, %s1462_s27  ;;  %s1466_s18 = smov (!%p395_p8, %s392_s18), 5 }
  0x13   : > { %s1468_s26 = smov (!%p404_p9, %s1229_s26), 3  ;;  %s1062_s12 = sshll.u32 %s1462_s27, 2 }
  0x14   : > { %s379_s19 = sadd.s32 %s1161_s14, %s377_s13  ;;  %s388_s24 = sadd.s32 %s1161_s14, %s1464_s15 }
  0x15   : > { %s1059_s20 = sshll.u32 %s379_s19, 2  ;;  %s1060_s25 = sshll.u32 %s388_s24, 2 }
  0x16   : > { %s381_s23 = scalar_lea.vmem %s1443_s0, %s1059_s20  ;;  %s398_s9 = sadd.s32 %s1161_s14, %s1466_s18 }
  0x17   : > { %v419_v7 = vld [vmem:[%s381_s23] sm:$0x7]  ;;  %s390_s16 = scalar_lea.vmem %s1444_s1, %s1060_s25  ;;  %s1061_s17 = sshll.u32 %s398_s9, 2 }
  0x18   : > { %v1067_v8 = vcombine.low %v419_v7, %v419_v7  ;;  %1116 = vmatmul.mubr.msk.bf16.vlgmr.msra.gmra.mrb[0].mxu1 %vm433_vm2, %v419_v7  ;;  %s400_s22 = scalar_lea.vmem %s1445_s2, %s1061_s17  ;;  %v577_v14 = vld [vmem:[%s390_s16] sm:$0x7]  ;;  %s407_s13 = sadd.s32 %s1062_s12, %s1468_s26 }
  0x19   : > { %1126 = vmatpush3.bf16.msra.mxu1 %v584_v6  ;;  %1127 = vmatprep.mubr.msk.bf16.mxu1 %vm1248_vm1, %v1247_v2  ;;  %v736_v15 = vld [vmem:[%s400_s22] sm:$0x7]  ;;  %v1075_v19 = vcombine.low %v577_v14, %v577_v14  ;;  %s903_s16 = sld [smem:[#allocation2]]  ;;  %s1063_s17 = sshll.u32 %s407_s13, 1 }
  0x1a   : > { %v427_v9 = vshrl.u32 %v1067_v8, 16  ;;  %v429_v10 = vshll.u32 %v1067_v8, 16  ;;  %1137 = vmatprep.subr.bf16.mxu1 %v1247_v2  ;;  %v1082_v20 = vcombine.low %v736_v15, %v736_v15  ;;  %v529_v22 = vrot.slane %v1067_v8, 1  ;;  %s409_s15 = scalar_lea.vmem %s1449_s6, %s1063_s17  ;;  %s417_s14 = scalar_lea.vmem %s1450_s7, %s1063_s17 }
  0x1b   : > { %v635_v23 = vshll.u32 %v1075_v19, 16  ;;  %v688_v24 = vrot.slane %v1075_v19, 1  ;;  %v633_v29 = vshrl.u32 %v1075_v19, 16 }
  0x1c   : > { %v431_v12 = vrot.slane %v429_v10, 1  ;;  %v794_v26 = vshll.u32 %v1082_v20, 16  ;;  %v792_v31 = vshrl.u32 %v1082_v20, 16  ;;  %v847_v39 = vrot.slane %v1082_v20, 1 }
  0x1d   : > { %v637_v30 = vrot.slane %v635_v23, 1 }
  0x1e   : > { %v432_v16 = vor.u32 %v431_v12, %v427_v9  ;;  %v796_v32 = vrot.slane %v794_v26, 1 }
  0x1f   : > { %v638_v34 = vor.u32 %v637_v30, %v633_v29  ;;  %v905_v20 = vstv %s903_s16 }
  0x20   : > { %1110 = vmatmul.mubr.msk.bf16.vlgmr.msra.gmra.mrb[0].mxu0 %vm433_vm2, %v432_v16  ;;  %1128 = vmatmul.mubr.msk.bf16.vlgmr.msra.gmra.mrb[4].mxu1 %vm433_vm2, %v577_v14  ;;  %v797_v35 = vor.u32 %v796_v32, %v792_v31  ;;  %v1086_v16 = vld [vmem:[%s1447_s4] ss:$0 sm:$0xff] }
  0x21   : > { %1120 = vmatpush3.bf16.msra.mxu0 %v534_v17  ;;  %1121 = vmatprep.mubr.msk.bf16.mxu0 %vm1248_vm1, %v1247_v2 }
  0x22   : > { %1131 = vmatprep.subr.bf16.mxu0 %v1247_v2  ;;  %1138 = vmatpush3.bf16.msra.mxu1 %v693_v18  ;;  %v908_v18 = vld [vmem:[%s409_s15] sm:$0x3] }
  0x23   : > { %1139 = vmatprep.mubr.msk.bf16.mxu1 %vm1248_vm1, %v1247_v2  ;;  %1149 = vmatprep.subr.bf16.mxu1 %v1247_v2 }
  0x28   : > { %1122 = vmatmul.mubr.msk.bf16.vlgmr.msra.gmra.mrb[4].mxu0 %vm433_vm2, %v529_v22  ;;  %1140 = vmatmul.mubr.msk.bf16.vlgmr.msra.gmra.mrb[8].mxu1 %vm433_vm2, %v688_v24  ;;  %v909_v24 = vunpack.c.l.bf16 %v908_v18 }
  0x29   : > { %1132 = vmatpush3.bf16.msra.mxu0 %v643_v27  ;;  %1133 = vmatprep.mubr.msk.bf16.mxu0 %vm1248_vm1, %v1247_v2 }
  0x2a   : > { %1143 = vmatprep.subr.bf16.mxu0 %v1247_v2  ;;  %1150 = vmatpush3.bf16.msra.mxu1 %v802_v28 }
  0x2b   : > { %1151 = vmatprep.mubr.msk.bf16.mxu1 %vm1248_vm1, %v1247_v2 }
  0x30   : > { %1134 = vmatmul.mubr.msk.bf16.vlgmr.msra.gmra.mrb[8].mxu0 %vm433_vm2, %v638_v34  ;;  %1152 = vmatmul.mubr.msk.bf16.vlgmr.msra.gmra.mrb[12].mxu1 %vm433_vm2, %v797_v35 }
  0x31   : > { %1144 = vmatpush3.bf16.msra.mxu0 %v743_v36  ;;  %1145 = vmatprep.mubr.msk.bf16.mxu0 %vm1248_vm1, %v1247_v2 }
  0x32   : > { %1155 = vmatprep.subr.bf16.mxu0 %v1247_v2 }
  0x38   : > { %1146 = vmatmul.mubr.msk.bf16.vlgmr.msra.gmra.mrb[12].mxu0 %vm433_vm2, %v736_v15 }
  0x39   : > { %1156 = vmatpush3.bf16.msra.mxu0 %v852_v38  ;;  %1157 = vmatprep.mubr.msk.bf16.mxu0 %vm1248_vm1, %v1247_v2 }
  0x40   : > { %1158 = vmatmul.mubr.msk.bf16.vlgmr.msra.gmra.mrb[16].mxu0 %vm433_vm2, %v847_v39 }
  0xeb   : > { %v521_v40 = vpop.f32.mrb[0].mxu1 }
  0xec   : > { %v1117_v41 = vpop.f32.mrb[1].mxu1 }
  0xed   : > { %v524_v42 = vpop.f32.mrb[2].mxu1 }
  0xee   : > { %v1118_v43 = vpop.f32.mrb[3].mxu1 }
  0xf3   : > { %v475_v44 = vpop.f32.mrb[0].mxu0  ;;  %v620_v45 = vpop.f32.mrb[4].mxu1 }
  0xf4   : > { %v522_v46 = vadd.f32 %v521_v40, %v475_v44  ;;  %v1111_v47 = vpop.f32.mrb[1].mxu0  ;;  %v1129_v48 = vpop.f32.mrb[5].mxu1 }
  0xf5   : > { %v478_v49 = vpop.f32.mrb[2].mxu0  ;;  %v623_v50 = vpop.f32.mrb[6].mxu1 }
  0xf6   : > { %v1112_v51 = vpop.f32.mrb[3].mxu0  ;;  %v1130_v52 = vpop.f32.mrb[7].mxu1 }
  0xfb   : > { %v570_v53 = vpop.f32.mrb[4].mxu0  ;;  %v729_v54 = vpop.f32.mrb[8].mxu1 }
  0xfc   : > { %v576_v55 = vadd.f32 %v570_v53, %v522_v46  ;;  %v1123_v56 = vpop.f32.mrb[5].mxu0  ;;  %v1141_v57 = vpop.f32.mrb[9].mxu1 }
  0xfd   : > { %v573_v58 = vpop.f32.mrb[6].mxu0  ;;  %v732_v59 = vpop.f32.mrb[10].mxu1 }
  0xfe   : > { %v626_v60 = vadd.f32 %v620_v45, %v576_v55  ;;  %v1124_v61 = vpop.f32.mrb[7].mxu0  ;;  %v1142_v62 = vpop.f32.mrb[11].mxu1 }
 0x103   : > { %v679_v63 = vpop.f32.mrb[8].mxu0  ;;  %v838_v0 = vpop.f32.mrb[12].mxu1 }
 0x104   : > { %v685_v1 = vadd.f32 %v679_v63, %v626_v60  ;;  %v1135_v2 = vpop.f32.mrb[9].mxu0  ;;  %v1153_v3 = vpop.f32.mrb[13].mxu1 }
 0x105   : > { %v682_v4 = vpop.f32.mrb[10].mxu0  ;;  %v841_v5 = vpop.f32.mrb[14].mxu1 }
 0x106   : > { %v735_v6 = vadd.f32 %v729_v54, %v685_v1  ;;  %v1136_v7 = vpop.f32.mrb[11].mxu0  ;;  %v1154_v8 = vpop.f32.mrb[15].mxu1 }
 0x10b   : > { %v779_v9 = vpop.f32.mrb[12].mxu0 }
 0x10c   : > { %v785_v10 = vadd.f32 %v779_v9, %v735_v6  ;;  %v1147_v11 = vpop.f32.mrb[13].mxu0 }
 0x10d   : > { %v782_v12 = vpop.f32.mrb[14].mxu0 }
 0x10e   : > { %v844_v13 = vadd.f32 %v838_v0, %v785_v10  ;;  %v1148_v14 = vpop.f32.mrb[15].mxu0 }
 0x113   : > { %v888_v15 = vpop.f32.mrb[16].mxu0 }
 0x114   : > { %v894_v17 = vadd.f32 %v888_v15, %v844_v13  ;;  %v1159_v19 = vpop.f32.mrb[17].mxu0 }
 0x115   : > { %v891_v21 = vpop.f32.mrb[18].mxu0 }
 0x116   : > { %v902_v22 = vadd.f32 %v1086_v16, %v894_v17  ;;  %v1160_v23 = vpop.f32.mrb[19].mxu0 }
 0x118   : > { %vm904_vm3 = vcmp.gt.f32.partialorder %v902_v22, 0.0  ;;  %v906_v25 = vmul.f32 %v905_v20, %v902_v22 }
 0x11a   : > { %v907_v26 = vsel %vm904_vm3, %v902_v22, %v906_v25 }
 0x11b   : > { %v910_v27 = vsub.f32 %v907_v26, %v909_v24 }
 0x11d   : > { %v911_v28 = vpack.c.bf16 %v910_v27, %v910_v27 }
 0x11f   : > { %913 = vst.msk [vmem:[%s417_s14] sm:$0x3] %vm912_vm4, %v911_v28 }
 0x120 PF: > { %s18_s30 = sadd.s32 1, %s1245_s30   ;;  %s1451_s26 = smov %s1237_s28 }
 0x121   : > { %p15_p10 = scmp.ge.s32.totalorder %s18_s30, 10   ;;  %s1452_s27 = smov %s1241_s29 }
 0x122   : > { %s1453_s28 = smov %s1456_s5  ;;  %s1454_s29 = smov %s1460_s8 }
 0x123   :  { %17 = sbr.rel (!%p15_p10) target bundleno = 3 (0x3), region = 95 }

// kernel: dblock_forward.5
= control target key start
LH: loop header
LB: loop body
LE: loop exit
PB: predicated region body
PF: predicated region fallthrough
CT: control target
= control target key end

     0   :  { %s1751_s26 = smov 0   ;;  %s1753_s27 = smov 0   ;;  %s2006_s0 = inlined_call_operand.vmem [shape: bf16[2,6,6,64], index: 0, kind: input, shape index: {}, may-alias: {0,1,2}]   ;;  %s2007_s1 = inlined_call_operand.vmem [shape: bf16[2,6,6,64], index: 1, kind: input, shape index: {}, may-alias: {0,1,2}]   ;;  %s2008_s2 = inlined_call_operand.vmem [shape: bf16[2,6,6,64], index: 2, kind: input, shape index: {}, may-alias: {0,1,2}]   ;;  %s2009_s3 = inlined_call_operand.vmem [shape: bf16[3,3,64,4], index: 3, kind: input, shape index: {}]   ;;  %s2010_s4 = inlined_call_operand.vmem [shape: f32[1,4], index: 4, kind: input, shape index: {}]   ;;  %s2011_s5 = inlined_call_operand.<no memory space> [shape: f32[1,1], index: 5, kind: input, shape index: {}]   ;;  %s2012_s6 = inlined_call_operand.vmem [shape: bf16[2,4,4,4], index: 6, kind: input, shape index: {}]   ;;  %s2013_s7 = inlined_call_operand.vmem [shape: f32[2,4,4,4], index: 7, kind: output, shape index: {}]  }
   0x1   :  { %12 = sst [smem:[#allocation2]] %s2011_s5  ;;  %s1755_s28 = smov 0  }
   0x2   :  { %s1757_s29 = smov 0   ;;  %s1759_s30 = smov 0  }
   0x3 LB: > { %s27_s5 = sadd.s32 1, %s1696_s28  ;;  %s30_s8 = sadd.s32 1, %s1700_s29  ;;  %s1704_s30 = sphi %s1759_s30, %s18_s30   ;;  %s1700_s29 = sphi %s1757_s29, %s2017_s29   ;;  %s1696_s28 = sphi %s1755_s28, %s2016_s28   ;;  %s1692_s27 = sphi %s1753_s27, %s2015_s27   ;;  %s1688_s26 = sphi %s1751_s26, %s2014_s26  }
   0x4   : > { %p28_p0 = scmp.ge.s32.totalorder %s27_s5, 4  ;;  %p1308_p1 = scmp.ge.s32.totalorder %s1704_s30, 1 }
   0x5   : > { %p310_p2 = scmp.lt.s32.totalorder %s1704_s30, 9 }
   0x6   : > { %s2019_s5 = smov (%p28_p0, %s27_s5), 0  ;;  %s2021_s8 = smov (!%p28_p0, %s30_s8), %s1700_s29 }
   0x7   : > { %p311_p3 = pnand %p1308_p1, %p310_p2  ;;  %p32_p4 = scmp.ge.s32.totalorder %s2021_s8, 2 }
   0x8   : > { %v1627_v0 = vld [vmem:[%s2009_s3 + $0x20] sm:$0xff] (!%p311_p3)   ;;  %v1706_v1 = vmov (!%p311_p3), 0.0   ;;  %v1629_v3 = vld [vmem:[%s2009_s3 + $0x28] sm:$0xff] (!%p311_p3)   ;;  %vm1707_vm0 = vmmov (!%p311_p3), 0   ;;  %p374_p5 = scmp.lt.s32.totalorder (!%p311_p3), %s1692_s27, 1  ;;  %p376_p6 = scmp.lt.s32.totalorder (!%p311_p3), %s1688_s26, 5 }
   0x9   : > { %s2023_s8 = smov (%p32_p4, %s2021_s8), 0  ;;  %314 = sbr.rel (%p311_p3) target bundleno = 318 (0x13e), region = 48 }
   0xa   : > { %1476 = vmatprep.subr.bf16.mxu0 (!%p311_p3), %v1706_v1  ;;  %1488 = vmatprep.subr.bf16.mxu1 (!%p311_p3), %v1706_v1  ;;  %v1628_v2 = vld [vmem:[%s2009_s3] sm:$0xff] (!%p311_p3)   ;;  %v1630_v4 = vld [vmem:[%s2009_s3 + $0x8] sm:$0xff] (!%p311_p3)   ;;  %v1631_v5 = vld [vmem:[%s2009_s3 + $0x30] sm:$0xff] (!%p311_p3)   ;;  %s382_s15 = sadd.s32 (!%p311_p3), 1, %s1688_s26  ;;  %vm471_vm1 = vcmask (!%p311_p3), 523264   ;;  %p404_p9 = scmp.lt.s32.totalorder (!%p311_p3), %s1688_s26, 3 }
   0xb   : > { %1477 = vmatpush3.bf16.msra.mxu0 (!%p311_p3), %v1627_v0  ;;  %1484 = vmatprep.mubr.msk.bf16.mxu0 (!%p311_p3), %vm1707_vm0, %v1706_v1  ;;  %v1632_v6 = vld [vmem:[%s2009_s3 + $0x10] sm:$0xff] (!%p311_p3)   ;;  %v1633_v7 = vld [vmem:[%s2009_s3 + $0x38] sm:$0xff] (!%p311_p3)   ;;  %p385_p7 = scmp.lt.s32.totalorder (!%p311_p3), %s382_s15, 5  ;;  %v1637_v13 = vld [vmem:[%s2009_s3 + $0x60] sm:$0xff] (!%p311_p3)   ;;  %vm1162_vm3 = vcmask (!%p311_p3), 27648  }
   0xc   : > { %1489 = vmatpush3.bf16.msra.mxu1 (!%p311_p3), %v1628_v2  ;;  %1478 = vmatprep.subr.bf16.mxu0 (!%p311_p3), %v1706_v1  ;;  %v1634_v8 = vld [vmem:[%s2009_s3 + $0x18] sm:$0xff] (!%p311_p3)   ;;  %v1636_v15 = vld [vmem:[%s2009_s3 + $0x40] sm:$0xff] (!%p311_p3)   ;;  %v1639_v17 = vld [vmem:[%s2009_s3 + $0x68] sm:$0xff] (!%p311_p3)  }
   0xd   : > { %1490 = vmatprep.subr.bf16.mxu1 (!%p311_p3), %v1706_v1  ;;  %1496 = vmatprep.mubr.msk.bf16.mxu1 (!%p311_p3), %vm1707_vm0, %v1706_v1  ;;  %v1638_v18 = vld [vmem:[%s2009_s3 + $0x48] sm:$0xff] (!%p311_p3)   ;;  %v1641_v19 = vld [vmem:[%s2009_s3 + $0x70] sm:$0xff] (!%p311_p3)   ;;  %v1643_v21 = vld [vmem:[%s2009_s3 + $0x78] sm:$0xff] (!%p311_p3)  }
   0xe   : > { %v1640_v20 = vld [vmem:[%s2009_s3 + $0x50] sm:$0xff] (!%p311_p3)   ;;  %v1642_v22 = vld [vmem:[%s2009_s3 + $0x58] sm:$0xff] (!%p311_p3)   ;;  %v1646_v23 = vld [vmem:[%s2009_s3 + $0xa0] sm:$0xff] (!%p311_p3)  }
   0xf   : > { %1479 = vmatpush3.bf16.msra.mxu0 (!%p311_p3), %v1629_v3  ;;  %v1644_v26 = vld [vmem:[%s2009_s3 + $0x80] sm:$0xff] (!%p311_p3)   ;;  %v1648_v27 = vld [vmem:[%s2009_s3 + $0xa8] sm:$0xff] (!%p311_p3)   ;;  %v1650_v30 = vld [vmem:[%s2009_s3 + $0xb0] sm:$0xff] (!%p311_p3)  }
  0x10   : > { %s2025_s27 = smov (!%p374_p5, %s1692_s27), 1  ;;  %1491 = vmatpush3.bf16.msra.mxu1 %v1630_v4  ;;  %1480 = vmatprep.subr.bf16.mxu0 %v1706_v1  ;;  %s2027_s15 = smov (!%p385_p7, %s382_s15), 5  ;;  %v1647_v29 = vld [vmem:[%s2009_s3 + $0x88] sm:$0xff]   ;;  %v1649_v32 = vld [vmem:[%s2009_s3 + $0x90] sm:$0xff]   ;;  %v1652_v33 = vld [vmem:[%s2009_s3 + $0xb8] sm:$0xff]  }
  0x11   : > { %s377_s17 = scalar_select %p376_p6, %s1688_s26, 5  ;;  %1492 = vmatprep.subr.bf16.mxu1 %v1706_v1  ;;  %v1651_v36 = vld [vmem:[%s2009_s3 + $0x98] sm:$0xff]   ;;  %v1654_v38 = vld [vmem:[%s2009_s3 + $0xe0] sm:$0xff]   ;;  %v1656_v43 = vld [vmem:[%s2009_s3 + $0xe8] sm:$0xff]  }
  0x12   : > { %s1815_s20 = smul.u32 6, %s2025_s27  ;;  %v1653_v41 = vld [vmem:[%s2009_s3 + $0xc0] sm:$0xff]   ;;  %v1655_v44 = vld [vmem:[%s2009_s3 + $0xc8] sm:$0xff]   ;;  %v1658_v46 = vld [vmem:[%s2009_s3 + $0xf0] sm:$0xff]   ;;  %s1312_s18 = sshll.u32 %s2025_s27, 2 }
  0x13   : > { %1481 = vmatpush3.bf16.msra.mxu0 %v1631_v5  ;;  %v1657_v47 = vld [vmem:[%s2009_s3 + $0xd0] sm:$0xff]   ;;  %v1660_v50 = vld [vmem:[%s2009_s3 + $0xf8] sm:$0xff]   ;;  %v1662_v53 = vld [vmem:[%s2009_s3 + $0x100] sm:$0xff]  }
  0x14   : > { %s379_s23 = sadd.s32 %s1815_s20, %s377_s17  ;;  %1493 = vmatpush3.bf16.msra.mxu1 %v1632_v6  ;;  %1482 = vmatprep.subr.bf16.mxu0 %v1706_v1  ;;  %s388_s25 = sadd.s32 %s1815_s20, %s2027_s15  ;;  %v1659_v51 = vld [vmem:[%s2009_s3 + $0xd8] sm:$0xff]   ;;  %v1663_v54 = vld [vmem:[%s2009_s3 + $0x108] sm:$0xff]   ;;  %v1664_v55 = vld [vmem:[%s2009_s3 + $0x110] sm:$0xff]  }
  0x15   : > { %s1309_s9 = sshll.u32 %s379_s23, 2  ;;  %1494 = vmatprep.subr.bf16.mxu1 %v1706_v1  ;;  %s1310_s13 = sshll.u32 %s388_s25, 2  ;;  %v1665_v56 = vld [vmem:[%s2009_s3 + $0x118] sm:$0xff]  }
  0x16   : > { %s381_s14 = scalar_lea.vmem %s2006_s0, %s1309_s9  ;;  %s392_s15 = sadd.s32 2, %s1688_s26 }
  0x17   : > { %v419_v9 = vld [vmem:[%s381_s14] sm:$0x7]  ;;  %1483 = vmatpush3.bf16.msra.mxu0 %v1633_v7  ;;  %s390_s19 = scalar_lea.vmem %s2007_s1, %s1310_s13  ;;  %p395_p8 = scmp.lt.s32.totalorder %s392_s15, 5 }
  0x18   : > { %v1324_v10 = vcombine.low %v419_v9, %v419_v9  ;;  %1495 = vmatpush3.bf16.msra.mxu1 %v1634_v8  ;;  %1500 = vmatprep.subr.bf16.mxu0 %v1706_v1  ;;  %v660_v24 = vld [vmem:[%s390_s19] sm:$0x7]  ;;  %s2031_s26 = smov (!%p404_p9, %s1688_s26), 3 }
  0x19   : > { %1512 = vmatprep.subr.bf16.mxu1 %v1706_v1  ;;  %s2029_s15 = smov (!%p395_p8, %s392_s15), 5  ;;  %v1369_v28 = vcombine.low %v660_v24, %v660_v24  ;;  %s407_s19 = sadd.s32 %s1312_s18, %s2031_s26 }
  0x1a   : > { %v441_v11 = vshrl.u32 %v1324_v10, 16  ;;  %v443_v12 = vshll.u32 %v1324_v10, 16  ;;  %v591_v25 = vrot.slane %v1324_v10, 1  ;;  %s398_s14 = sadd.s32 %s1815_s20, %s2029_s15  ;;  %s1313_s22 = sshll.u32 %s407_s19, 1 }
  0x1b   : > { %1497 = vmatmul.mubr.msk.bf16.vlgmr.msra.gmra.mrb[0].mxu1 %vm471_vm1, %v419_v9  ;;  %v753_v31 = vshll.u32 %v1369_v28, 16  ;;  %s1311_s21 = sshll.u32 %s398_s14, 2  ;;  %v751_v34 = vshrl.u32 %v1369_v28, 16  ;;  %v834_v37 = vrot.slane %v1369_v28, 1  ;;  %s409_s15 = scalar_lea.vmem %s2012_s6, %s1313_s22 }
  0x1c   : > { %v445_v14 = vrot.slane %v443_v12, 1  ;;  %1513 = vmatpush3.bf16.msra.mxu1 %v1637_v13  ;;  %1520 = vmatprep.mubr.msk.bf16.mxu1 %vm1707_vm0, %v1706_v1  ;;  %s400_s24 = scalar_lea.vmem %s2008_s2, %s1311_s21  ;;  %s1154_s21 = sld [smem:[#allocation2]] }
  0x1d   : > { %1514 = vmatprep.subr.bf16.mxu1 %v1706_v1  ;;  %v755_v35 = vrot.slane %v753_v31, 1  ;;  %v903_v39 = vld [vmem:[%s400_s24] sm:$0x7]  ;;  %s1315_s27 = sshll.u32 %s407_s19, 2 }
  0x1e   : > { %v446_v16 = vor.u32 %v445_v14, %v441_v11  ;;  %v1409_v42 = vcombine.low %v903_v39, %v903_v39  ;;  %s417_s10 = scalar_lea.vmem %s2013_s7, %s1315_s27 }
  0x1f   : > { %v756_v40 = vor.u32 %v755_v35, %v751_v34  ;;  %v1428_v34 = vld [vmem:[%s2010_s4] ss:$0 sm:$0xff] }
  0x20   : > { %1485 = vmatmul.mubr.msk.bf16.vlgmr.msra.gmra.mrb[0].mxu0 %vm471_vm1, %v446_v16  ;;  %1515 = vmatpush3.bf16.msra.mxu1 %v1639_v17  ;;  %v996_v45 = vshll.u32 %v1409_v42, 16  ;;  %v994_v48 = vshrl.u32 %v1409_v42, 16  ;;  %v1077_v57 = vrot.slane %v1409_v42, 1 }
  0x21   : > { %1501 = vmatpush3.bf16.msra.mxu0 %v1636_v15  ;;  %1508 = vmatprep.mubr.msk.bf16.mxu0 %vm1707_vm0, %v1706_v1 }
  0x22   : > { %1502 = vmatprep.subr.bf16.mxu0 %v1706_v1  ;;  %1516 = vmatprep.subr.bf16.mxu1 %v1706_v1  ;;  %v998_v49 = vrot.slane %v996_v45, 1 }
  0x24   : > { %1517 = vmatpush3.bf16.msra.mxu1 %v1641_v19  ;;  %v999_v52 = vor.u32 %v998_v49, %v994_v48 }
  0x25   : > { %1503 = vmatpush3.bf16.msra.mxu0 %v1638_v18  ;;  %1518 = vmatprep.subr.bf16.mxu1 %v1706_v1 }
  0x26   : > { %1504 = vmatprep.subr.bf16.mxu0 %v1706_v1 }
  0x28   : > { %1519 = vmatpush3.bf16.msra.mxu1 %v1643_v21 }
  0x29   : > { %1505 = vmatpush3.bf16.msra.mxu0 %v1640_v20  ;;  %1536 = vmatprep.subr.bf16.mxu1 %v1706_v1 }
  0x2a   : > { %1506 = vmatprep.subr.bf16.mxu0 %v1706_v1 }
  0x2b   : > { %1521 = vmatmul.mubr.msk.bf16.vlgmr.msra.gmra.mrb[4].mxu1 %vm471_vm1, %v660_v24 }
  0x2c   : > { %1537 = vmatpush3.bf16.msra.mxu1 %v1646_v23  ;;  %1544 = vmatprep.mubr.msk.bf16.mxu1 %vm1707_vm0, %v1706_v1 }
  0x2d   : > { %1507 = vmatpush3.bf16.msra.mxu0 %v1642_v22  ;;  %1538 = vmatprep.subr.bf16.mxu1 %v1706_v1 }
  0x2e   : > { %1524 = vmatprep.subr.bf16.mxu0 %v1706_v1 }
  0x30   : > { %1509 = vmatmul.mubr.msk.bf16.vlgmr.msra.gmra.mrb[4].mxu0 %vm471_vm1, %v591_v25  ;;  %1539 = vmatpush3.bf16.msra.mxu1 %v1648_v27 }
  0x31   : > { %1525 = vmatpush3.bf16.msra.mxu0 %v1644_v26  ;;  %1532 = vmatprep.mubr.msk.bf16.mxu0 %vm1707_vm0, %v1706_v1 }
  0x32   : > { %1526 = vmatprep.subr.bf16.mxu0 %v1706_v1  ;;  %1540 = vmatprep.subr.bf16.mxu1 %v1706_v1 }
  0x34   : > { %1541 = vmatpush3.bf16.msra.mxu1 %v1650_v30 }
  0x35   : > { %1527 = vmatpush3.bf16.msra.mxu0 %v1647_v29  ;;  %1542 = vmatprep.subr.bf16.mxu1 %v1706_v1 }
  0x36   : > { %1528 = vmatprep.subr.bf16.mxu0 %v1706_v1 }
  0x38   : > { %1543 = vmatpush3.bf16.msra.mxu1 %v1652_v33 }
  0x39   : > { %1529 = vmatpush3.bf16.msra.mxu0 %v1649_v32  ;;  %1560 = vmatprep.subr.bf16.mxu1 %v1706_v1 }
  0x3a   : > { %1530 = vmatprep.subr.bf16.mxu0 %v1706_v1 }
  0x3b   : > { %1545 = vmatmul.mubr.msk.bf16.vlgmr.msra.gmra.mrb[8].mxu1 %vm471_vm1, %v834_v37 }
  0x3c   : > { %1561 = vmatpush3.bf16.msra.mxu1 %v1654_v38  ;;  %1568 = vmatprep.mubr.msk.bf16.mxu1 %vm1707_vm0, %v1706_v1  ;;  %v1156_v38 = vstv %s1154_s21 }
  0x3d   : > { %1531 = vmatpush3.bf16.msra.mxu0 %v1651_v36  ;;  %1562 = vmatprep.subr.bf16.mxu1 %v1706_v1  ;;  %v1159_v36 = vld [vmem:[%s409_s15] sm:$0x3] }
  0x3e   : > { %1548 = vmatprep.subr.bf16.mxu0 %v1706_v1  ;;  %v1160_v42 = vunpack.c.l.bf16 %v1159_v36 }
  0x40   : > { %1533 = vmatmul.mubr.msk.bf16.vlgmr.msra.gmra.mrb[8].mxu0 %vm471_vm1, %v756_v40  ;;  %1563 = vmatpush3.bf16.msra.mxu1 %v1656_v43 }
  0x41   : > { %1549 = vmatpush3.bf16.msra.mxu0 %v1653_v41  ;;  %1556 = vmatprep.mubr.msk.bf16.mxu0 %vm1707_vm0, %v1706_v1 }
  0x42   : > { %1550 = vmatprep.subr.bf16.mxu0 %v1706_v1  ;;  %1564 = vmatprep.subr.bf16.mxu1 %v1706_v1 }
  0x44   : > { %1565 = vmatpush3.bf16.msra.mxu1 %v1658_v46 }
  0x45   : > { %1551 = vmatpush3.bf16.msra.mxu0 %v1655_v44  ;;  %1566 = vmatprep.subr.bf16.mxu1 %v1706_v1 }
  0x46   : > { %1552 = vmatprep.subr.bf16.mxu0 %v1706_v1 }
  0x48   : > { %1567 = vmatpush3.bf16.msra.mxu1 %v1660_v50 }
  0x49   : > { %1553 = vmatpush3.bf16.msra.mxu0 %v1657_v47 }
  0x4a   : > { %1554 = vmatprep.subr.bf16.mxu0 %v1706_v1 }
  0x4b   : > { %1569 = vmatmul.mubr.msk.bf16.vlgmr.msra.gmra.mrb[12].mxu1 %vm471_vm1, %v999_v52 }
  0x4d   : > { %1555 = vmatpush3.bf16.msra.mxu0 %v1659_v51 }
  0x4e   : > { %1572 = vmatprep.subr.bf16.mxu0 %v1706_v1 }
  0x50   : > { %1557 = vmatmul.mubr.msk.bf16.vlgmr.msra.gmra.mrb[12].mxu0 %vm471_vm1, %v903_v39 }
  0x51   : > { %1573 = vmatpush3.bf16.msra.mxu0 %v1662_v53  ;;  %1580 = vmatprep.mubr.msk.bf16.mxu0 %vm1707_vm0, %v1706_v1 }
  0x52   : > { %1574 = vmatprep.subr.bf16.mxu0 %v1706_v1 }
  0x55   : > { %1575 = vmatpush3.bf16.msra.mxu0 %v1663_v54 }
  0x56   : > { %1576 = vmatprep.subr.bf16.mxu0 %v1706_v1 }
  0x59   : > { %1577 = vmatpush3.bf16.msra.mxu0 %v1664_v55 }
  0x5a   : > { %1578 = vmatprep.subr.bf16.mxu0 %v1706_v1 }
  0x5d   : > { %1579 = vmatpush3.bf16.msra.mxu0 %v1665_v56 }
  0x60   : > { %1581 = vmatmul.mubr.msk.bf16.vlgmr.msra.gmra.mrb[16].mxu0 %vm471_vm1, %v1077_v57 }
  0xee   : > { %v576_v58 = vpop.f32.mrb[0].mxu1 }
  0xef   : > { %v1498_v59 = vpop.f32.mrb[1].mxu1 }
  0xf0   : > { %v579_v61 = vpop.f32.mrb[2].mxu1 }
  0xf1   : > { %v1499_v0 = vpop.f32.mrb[3].mxu1 }
  0xf3   : > { %v509_v60 = vpop.f32.mrb[0].mxu0 }
  0xf4   : > { %v1486_v62 = vpop.f32.mrb[1].mxu0  ;;  %v577_v63 = vadd.f32 %v576_v58, %v509_v60 }
  0xf5   : > { %v512_v2 = vpop.f32.mrb[2].mxu0 }
  0xf6   : > { %v1487_v3 = vpop.f32.mrb[3].mxu0 }
  0xfe   : > { %v731_v4 = vpop.f32.mrb[4].mxu1 }
  0xff   : > { %v1522_v5 = vpop.f32.mrb[5].mxu1 }
 0x100   : > { %v734_v7 = vpop.f32.mrb[6].mxu1 }
 0x101   : > { %v1523_v1 = vpop.f32.mrb[7].mxu1 }
 0x103   : > { %v653_v6 = vpop.f32.mrb[4].mxu0 }
 0x104   : > { %v659_v8 = vadd.f32 %v653_v6, %v577_v63  ;;  %v1510_v9 = vpop.f32.mrb[5].mxu0 }
 0x105   : > { %v656_v10 = vpop.f32.mrb[6].mxu0 }
 0x106   : > { %v737_v11 = vadd.f32 %v731_v4, %v659_v8  ;;  %v1511_v12 = vpop.f32.mrb[7].mxu0 }
 0x10e   : > { %v896_v13 = vpop.f32.mrb[8].mxu1 }
 0x10f   : > { %v1546_v14 = vpop.f32.mrb[9].mxu1 }
 0x110   : > { %v899_v16 = vpop.f32.mrb[10].mxu1 }
 0x111   : > { %v1547_v19 = vpop.f32.mrb[11].mxu1 }
 0x113   : > { %v818_v15 = vpop.f32.mrb[8].mxu0 }
 0x114   : > { %v824_v17 = vadd.f32 %v818_v15, %v737_v11  ;;  %v1534_v18 = vpop.f32.mrb[9].mxu0 }
 0x115   : > { %v821_v20 = vpop.f32.mrb[10].mxu0 }
 0x116   : > { %v902_v21 = vadd.f32 %v896_v13, %v824_v17  ;;  %v1535_v22 = vpop.f32.mrb[11].mxu0 }
 0x11e   : > { %v1061_v23 = vpop.f32.mrb[12].mxu1 }
 0x11f   : > { %v1570_v24 = vpop.f32.mrb[13].mxu1 }
 0x120   : > { %v1064_v26 = vpop.f32.mrb[14].mxu1 }
 0x121   : > { %v1571_v29 = vpop.f32.mrb[15].mxu1 }
 0x123   : > { %v974_v25 = vpop.f32.mrb[12].mxu0 }
 0x124   : > { %v980_v27 = vadd.f32 %v974_v25, %v902_v21  ;;  %v1558_v28 = vpop.f32.mrb[13].mxu0 }
 0x125   : > { %v977_v30 = vpop.f32.mrb[14].mxu0 }
 0x126   : > { %v1067_v31 = vadd.f32 %v1061_v23, %v980_v27  ;;  %v1559_v32 = vpop.f32.mrb[15].mxu0 }
 0x133   : > { %v1139_v33 = vpop.f32.mrb[16].mxu0 }
 0x134   : > { %v1145_v35 = vadd.f32 %v1139_v33, %v1067_v31  ;;  %v1582_v37 = vpop.f32.mrb[17].mxu0 }
 0x135   : > { %v1142_v39 = vpop.f32.mrb[18].mxu0 }
 0x136   : > { %v1153_v40 = vadd.f32 %v1428_v34, %v1145_v35  ;;  %v1583_v41 = vpop.f32.mrb[19].mxu0 }
 0x138   : > { %vm1155_vm2 = vcmp.gt.f32.partialorder %v1153_v40, 0.0  ;;  %v1157_v43 = vmul.f32 %v1156_v38, %v1153_v40 }
 0x13a   : > { %v1158_v44 = vsel %vm1155_vm2, %v1153_v40, %v1157_v43 }
 0x13b   : > { %v1161_v45 = vadd.f32 %v1160_v42, %v1158_v44 }
 0x13d   : > { %1163 = vst.msk [vmem:[%s417_s10] sm:$0xf] %vm1162_vm3, %v1161_v45 }
 0x13e PF: > { %s18_s30 = sadd.s32 1, %s1704_s30   ;;  %s2014_s26 = smov %s1696_s28 }
 0x13f   : > { %p15_p10 = scmp.ge.s32.totalorder %s18_s30, 10   ;;  %s2015_s27 = smov %s1700_s29 }
 0x140   : > { %s2016_s28 = smov %s2019_s5  ;;  %s2017_s29 = smov %s2023_s8 }
 0x141   :  { %17 = sbr.rel (!%p15_p10) target bundleno = 3 (0x3), region = 95 }

</bundles_post_ra>
